<compile_context>
chip_gen: v7x
topology: tpu7x:2x2x1
jax: 0.10.0
libtpu: 0.0.40
codegen_flags: <defaults>
</compile_context>

<pallas_src>
import functools

import jax
import jax.numpy as jnp
from jax.experimental import pallas as pl
from jax.experimental.pallas import tpu as pltpu

HIDDEN_DIM = 128
NUM_ENC = 6
D_IN = 3 + 3 * 2 * NUM_ENC   # 39
D_OUT = 4
D_OUT_PAD = 8                # pad 4 -> 8 so the transposed output block is (8,128)-aligned


def _round_up(x: int, m: int) -> int:
    return (x + m - 1) // m * m


def _mlp_kernel(x_ref, w1_ref, b1_ref, w2_ref, b2_ref, w3t_ref, b3t_ref, o_ref,
                *, compute_dtype):
    # Matmul operands in compute_dtype (bf16 by default), accumulation in f32.
    x = x_ref[...].astype(compute_dtype)

    h1 = jnp.dot(x, w1_ref[...], preferred_element_type=jnp.float32)
    # Bias + ReLU in f32 on the VPU; the bf16 cast is fused so the f32 copy dies
    # before the next dot (bounds live VMEM at large row tiles).
    h1 = jnp.maximum(h1 + b1_ref[...], 0.0).astype(compute_dtype)

    h2 = jnp.dot(h1, w2_ref[...], preferred_element_type=jnp.float32)
    h2 = jnp.maximum(h2 + b2_ref[...], 0.0).astype(compute_dtype)

    # Layer 3 computed transposed: contract the feature dims of w3^T [8,128] and
    # h2 [tile,128] so the result is [D_OUT_PAD, tile] and the store is
    # lane-dense (full 128-lane vst instead of masked 4-lane partial stores).
    out_t = jax.lax.dot_general(
        w3t_ref[...], h2,
        dimension_numbers=(((1,), (1,)), ((), ())),
        preferred_element_type=jnp.float32)
    o_ref[...] = (out_t + b3t_ref[...]).astype(o_ref.dtype)


def _vmem_budget_bytes(tile: int, x_itemsize: int) -> int:
    """Generous per-step VMEM estimate (lane-padded buffers), plus headroom, <= 32 MiB."""
    lane = 128
    x_buf = 2 * tile * lane * x_itemsize                         # x double-buffer (39 lanes pad to 128)
    o_buf = 2 * D_OUT_PAD * tile * 4                             # output double-buffer (f32)
    w_buf = 2 * (_round_up(D_IN, 8) * lane * 2                   # w1 (bf16)
                 + HIDDEN_DIM * lane * 2                         # w2 (bf16)
                 + D_OUT_PAD * lane * 2                          # w3^T (bf16)
                 + 3 * 8 * lane * 4)                             # biases (f32, padded)
    h_tmp = tile * HIDDEN_DIM * (4 + 2) * 2                      # h1/h2: f32 + bf16 copies
    return min(x_buf + o_buf + w_buf + h_tmp + (6 << 20), 32 << 20)


@functools.partial(jax.jit, static_argnames=("tile_n", "use_bf16"))
def tiny_nerf_forward(x, params, *, tile_n=8192, use_bf16=True):
    """x: [N, D_IN] float32 (or bfloat16). Returns [N, D_OUT] float32."""
    w1, b1, w2, b2, w3, b3 = params
    n = x.shape[0]

    compute_dtype = jnp.bfloat16 if use_bf16 else jnp.float32
    w1c = w1.astype(compute_dtype)
    w2c = w2.astype(compute_dtype)
    # Layer-3 weight/bias, transposed and zero-padded to D_OUT_PAD rows.
    w3t = jnp.zeros((D_OUT_PAD, HIDDEN_DIM), compute_dtype)
    w3t = w3t.at[:D_OUT, :].set(w3.T.astype(compute_dtype))
    b3t = jnp.zeros((D_OUT_PAD, 1), jnp.float32)
    b3t = b3t.at[:D_OUT, :].set(b3.reshape(D_OUT, 1).astype(jnp.float32))

    # Row tile: large (default 8192) to amortize per-step pipeline overhead, but
    # clamped so the grid keeps >= 2 steps and the tile is a multiple of 128
    # (required by the lane-dense transposed output block).
    tile_cap = max(128, (tile_n // 128) * 128)
    tile = min(tile_cap, _round_up((n + 1) // 2, 128))
    n_pad = _round_up(n, tile)
    if n_pad != n:
        x = jnp.pad(x, ((0, n_pad - n), (0, 0)))

    grid = (n_pad // tile,)

    flops = 2 * n_pad * (D_IN * HIDDEN_DIM + HIDDEN_DIM * HIDDEN_DIM
                         + HIDDEN_DIM * D_OUT_PAD)
    bytes_accessed = (
        n_pad * D_IN * x.dtype.itemsize              # input
        + n_pad * D_OUT_PAD * 4                      # output (f32, padded rows)
        + sum(int(a.size) * a.dtype.itemsize
              for a in (w1c, b1, w2c, b2, w3t, b3t)))

    out_t = pl.pallas_call(
        functools.partial(_mlp_kernel, compute_dtype=compute_dtype),
        out_shape=jax.ShapeDtypeStruct((D_OUT_PAD, n_pad), jnp.float32),
        grid_spec=pltpu.PrefetchScalarGridSpec(
            num_scalar_prefetch=0,
            grid=grid,
            in_specs=[
                pl.BlockSpec((tile, D_IN), lambda i: (i, 0)),              # x tile
                pl.BlockSpec((D_IN, HIDDEN_DIM), lambda i: (0, 0)),        # w1
                pl.BlockSpec((1, HIDDEN_DIM), lambda i: (0, 0)),           # b1
                pl.BlockSpec((HIDDEN_DIM, HIDDEN_DIM), lambda i: (0, 0)),  # w2
                pl.BlockSpec((1, HIDDEN_DIM), lambda i: (0, 0)),           # b2
                pl.BlockSpec((D_OUT_PAD, HIDDEN_DIM), lambda i: (0, 0)),   # w3^T (padded)
                pl.BlockSpec((D_OUT_PAD, 1), lambda i: (0, 0)),            # b3^T (padded)
            ],
            out_specs=pl.BlockSpec((D_OUT_PAD, tile), lambda i: (0, i)),   # lane-dense
        ),
        compiler_params=pltpu.CompilerParams(
            dimension_semantics=("parallel",),
            vmem_limit_bytes=_vmem_budget_bytes(tile, x.dtype.itemsize),
        ),
        cost_estimate=pl.CostEstimate(
            flops=flops, transcendentals=0, bytes_accessed=bytes_accessed),
    )(x, w1c, b1, w2c, b2, w3t, b3t)

    # Back to the module's [N, 4] layout (drop padded output rows and padded samples).
    return out_t[:D_OUT, :n].T


def init_params(key):
    """Deterministic init mimicking nn.Linear's U(-1/sqrt(fan_in), 1/sqrt(fan_in))."""
    keys = jax.random.split(key, 6)

    def linear(kw, kb, fan_in, fan_out):
        bound = 1.0 / jnp.sqrt(fan_in)
        # stored as [fan_in, fan_out] (transpose of PyTorch's [out, in])
        w = jax.random.uniform(kw, (fan_in, fan_out), jnp.float32, -bound, bound)
        b = jax.random.uniform(kb, (1, fan_out), jnp.float32, -bound, bound)
        return w, b

    w1, b1 = linear(keys[0], keys[1], D_IN, HIDDEN_DIM)
    w2, b2 = linear(keys[2], keys[3], HIDDEN_DIM, HIDDEN_DIM)
    w3, b3 = linear(keys[4], keys[5], HIDDEN_DIM, D_OUT)
    return (w1, b1, w2, b2, w3, b3)


def reference_forward(x, params, compute_dtype=jnp.float32):
    w1, b1, w2, b2, w3, b3 = params

    def dot(a, w):
        return jnp.dot(a.astype(compute_dtype), w.astype(compute_dtype),
                       preferred_element_type=jnp.float32)

    h = jnp.maximum(dot(x, w1) + b1, 0.0)
    h = jnp.maximum(dot(h, w2) + b2, 0.0)
    return dot(h, w3) + b3


if __name__ == "__main__":
    key = jax.random.PRNGKey(0)
    k_x, k_p = jax.random.split(key)

    # Small batch of ray samples; deliberately NOT a multiple of the tile so the
    # padded-grid path runs, and big enough that the clamped tile (1024) still
    # yields a 2-step grid.
    N = 2000
    x = jax.random.normal(k_x, (N, D_IN), jnp.float32)
    params = init_params(k_p)

    out = jax.block_until_ready(tiny_nerf_forward(x, params))
    assert out.shape == (N, D_OUT), out.shape

    # Tight check against a reference that uses the same bf16-operand / f32-accum path.
    ref_bf16 = reference_forward(x, params, compute_dtype=jnp.bfloat16)
    assert jnp.allclose(out, ref_bf16, atol=1e-3, rtol=1e-3), "mismatch vs bf16 reference"

    # Loose sanity check against the full-f32 reference (bf16 rounding tolerance).
    ref_f32 = reference_forward(x, params, compute_dtype=jnp.float32)
    assert jnp.allclose(out, ref_f32, atol=5e-2, rtol=5e-2), "mismatch vs f32 reference"

    print("KERNEL_OK")
</pallas_src>

<mosaic_0001>
module attributes {stable_mosaic.version = 11 : i64} {
  func.func @_mlp_kernel(%arg0: i32, %arg1: memref<1024x39xf32, #tpu.memory_space<vmem>>, %arg2: memref<39x128xbf16, #tpu.memory_space<vmem>>, %arg3: memref<1x128xf32, #tpu.memory_space<vmem>>, %arg4: memref<128x128xbf16, #tpu.memory_space<vmem>>, %arg5: memref<1x128xf32, #tpu.memory_space<vmem>>, %arg6: memref<8x128xbf16, #tpu.memory_space<vmem>>, %arg7: memref<8x1xf32, #tpu.memory_space<vmem>>, %arg8: memref<8x1024xf32, #tpu.memory_space<vmem>>) attributes {dimension_semantics = [#tpu.dimension_semantics<parallel>], iteration_bounds = array<i64: 2>, scalar_prefetch = 0 : i64, scratch_operands = 0 : i64, tpu.core_type = #tpu.core_type<tc>, window_params = [{transform_indices = @transform_0, window_bounds = array<i64: 1024, 39>}, {pipeline_mode = #tpu.pipeline_mode<synchronous>, transform_indices = @transform_1, window_bounds = array<i64: 39, 128>}, {pipeline_mode = #tpu.pipeline_mode<synchronous>, transform_indices = @transform_2, window_bounds = array<i64: 1, 128>}, {pipeline_mode = #tpu.pipeline_mode<synchronous>, transform_indices = @transform_3, window_bounds = array<i64: 128, 128>}, {pipeline_mode = #tpu.pipeline_mode<synchronous>, transform_indices = @transform_4, window_bounds = array<i64: 1, 128>}, {pipeline_mode = #tpu.pipeline_mode<synchronous>, transform_indices = @transform_5, window_bounds = array<i64: 8, 128>}, {pipeline_mode = #tpu.pipeline_mode<synchronous>, transform_indices = @transform_6, window_bounds = array<i64: 8, 1>}, {transform_indices = @transform_7, window_bounds = array<i64: 8, 1024>}]} {
    %c0 = arith.constant 0 : index
    %c0_0 = arith.constant 0 : index
    %0 = vector.load %arg1[%c0, %c0_0] : memref<1024x39xf32, #tpu.memory_space<vmem>>, vector<1024x39xf32>
    %1 = arith.truncf %0 : vector<1024x39xf32> to vector<1024x39xbf16>
    %c0_1 = arith.constant 0 : index
    %c0_2 = arith.constant 0 : index
    %2 = vector.load %arg2[%c0_1, %c0_2] : memref<39x128xbf16, #tpu.memory_space<vmem>>, vector<39x128xbf16>
    %cst = arith.constant dense<0.000000e+00> : vector<1024x128xf32>
    %3 = tpu.matmul %1, %2, %cst {dimension_numbers = #tpu.dot_dimension_numbers<[1], [0], [0], [1], [0, 0, 1, 1], [], []>} : vector<1024x39xbf16>, vector<39x128xbf16>, vector<1024x128xf32> -> vector<1024x128xf32>
    %c0_3 = arith.constant 0 : index
    %c0_4 = arith.constant 0 : index
    %4 = vector.load %arg3[%c0_3, %c0_4] : memref<1x128xf32, #tpu.memory_space<vmem>>, vector<1x128xf32>
    %5 = vector.broadcast %4 : vector<1x128xf32> to vector<1024x128xf32>
    %6 = arith.addf %3, %5 : vector<1024x128xf32>
    %cst_5 = arith.constant 0.000000e+00 : f32
    %7 = vector.broadcast %cst_5 : f32 to vector<1024x128xf32>
    %8 = arith.maximumf %6, %7 : vector<1024x128xf32>
    %9 = arith.truncf %8 : vector<1024x128xf32> to vector<1024x128xbf16>
    %c0_6 = arith.constant 0 : index
    %c0_7 = arith.constant 0 : index
    %10 = vector.load %arg4[%c0_6, %c0_7] : memref<128x128xbf16, #tpu.memory_space<vmem>>, vector<128x128xbf16>
    %cst_8 = arith.constant dense<0.000000e+00> : vector<1024x128xf32>
    %11 = tpu.matmul %9, %10, %cst_8 {dimension_numbers = #tpu.dot_dimension_numbers<[1], [0], [0], [1], [0, 0, 1, 1], [], []>} : vector<1024x128xbf16>, vector<128x128xbf16>, vector<1024x128xf32> -> vector<1024x128xf32>
    %c0_9 = arith.constant 0 : index
    %c0_10 = arith.constant 0 : index
    %12 = vector.load %arg5[%c0_9, %c0_10] : memref<1x128xf32, #tpu.memory_space<vmem>>, vector<1x128xf32>
    %13 = vector.broadcast %12 : vector<1x128xf32> to vector<1024x128xf32>
    %14 = arith.addf %11, %13 : vector<1024x128xf32>
    %cst_11 = arith.constant 0.000000e+00 : f32
    %15 = vector.broadcast %cst_11 : f32 to vector<1024x128xf32>
    %16 = arith.maximumf %14, %15 : vector<1024x128xf32>
    %17 = arith.truncf %16 : vector<1024x128xf32> to vector<1024x128xbf16>
    %c0_12 = arith.constant 0 : index
    %c0_13 = arith.constant 0 : index
    %18 = vector.load %arg6[%c0_12, %c0_13] : memref<8x128xbf16, #tpu.memory_space<vmem>>, vector<8x128xbf16>
    %cst_14 = arith.constant dense<0.000000e+00> : vector<8x1024xf32>
    %19 = tpu.matmul %18, %17, %cst_14 {dimension_numbers = #tpu.dot_dimension_numbers<[1], [1], [0], [0], [0, 0, 1, 0], [], []>} : vector<8x128xbf16>, vector<1024x128xbf16>, vector<8x1024xf32> -> vector<8x1024xf32>
    %c0_15 = arith.constant 0 : index
    %c0_16 = arith.constant 0 : index
    %20 = vector.load %arg7[%c0_15, %c0_16] : memref<8x1xf32, #tpu.memory_space<vmem>>, vector<8x1xf32>
    %21 = vector.broadcast %20 : vector<8x1xf32> to vector<8x1024xf32>
    %22 = arith.addf %19, %21 : vector<8x1024xf32>
    %c0_17 = arith.constant 0 : index
    %c0_18 = arith.constant 0 : index
    %23 = vector.load %arg8[%c0_17, %c0_18] : memref<8x1024xf32, #tpu.memory_space<vmem>>, vector<8x1024xf32>
    tpu.vector_store %arg8[%c0_17, %c0_18], %22 {strides = array<i32>} : memref<8x1024xf32, #tpu.memory_space<vmem>>, vector<8x1024xf32>,
    return
  }
  func.func @transform_0(%arg0: i32) -> (i32, i32) {
    %c0_i32 = arith.constant 0 : i32
    %c0_i32_0 = arith.constant 0 : i32
    return %arg0, %c0_i32 : i32, i32
  }
  func.func @transform_1(%arg0: i32) -> (i32, i32) {
    %c0_i32 = arith.constant 0 : i32
    %c0_i32_0 = arith.constant 0 : i32
    %c0_i32_1 = arith.constant 0 : i32
    return %c0_i32, %c0_i32_0 : i32, i32
  }
  func.func @transform_2(%arg0: i32) -> (i32, i32) {
    %c0_i32 = arith.constant 0 : i32
    %c0_i32_0 = arith.constant 0 : i32
    %c0_i32_1 = arith.constant 0 : i32
    return %c0_i32, %c0_i32_0 : i32, i32
  }
  func.func @transform_3(%arg0: i32) -> (i32, i32) {
    %c0_i32 = arith.constant 0 : i32
    %c0_i32_0 = arith.constant 0 : i32
    %c0_i32_1 = arith.constant 0 : i32
    return %c0_i32, %c0_i32_0 : i32, i32
  }
  func.func @transform_4(%arg0: i32) -> (i32, i32) {
    %c0_i32 = arith.constant 0 : i32
    %c0_i32_0 = arith.constant 0 : i32
    %c0_i32_1 = arith.constant 0 : i32
    return %c0_i32, %c0_i32_0 : i32, i32
  }
  func.func @transform_5(%arg0: i32) -> (i32, i32) {
    %c0_i32 = arith.constant 0 : i32
    %c0_i32_0 = arith.constant 0 : i32
    %c0_i32_1 = arith.constant 0 : i32
    return %c0_i32, %c0_i32_0 : i32, i32
  }
  func.func @transform_6(%arg0: i32) -> (i32, i32) {
    %c0_i32 = arith.constant 0 : i32
    %c0_i32_0 = arith.constant 0 : i32
    %c0_i32_1 = arith.constant 0 : i32
    return %c0_i32, %c0_i32_0 : i32, i32
  }
  func.func @transform_7(%arg0: i32) -> (i32, i32) {
    %c0_i32 = arith.constant 0 : i32
    %c0_i32_0 = arith.constant 0 : i32
    return %c0_i32, %arg0 : i32, i32
  }
}

</mosaic_0001>

<bundles_post_ra>
// kernel: tiny_nerf_forward.1
= control target key start
LH: loop header
LB: loop body
LE: loop exit
PB: predicated region body
PF: predicated region fallthrough
CT: control target
= control target key end

     0   :  { %s3133_s24 = smov 0   ;;  %s3779_s0 = inlined_call_operand.vmem [shape: f32[2048,39], index: 0, kind: input, shape index: {}]   ;;  %s3780_s1 = inlined_call_operand.vmem [shape: bf16[39,128], index: 1, kind: input, shape index: {}]   ;;  %s3781_s2 = inlined_call_operand.vmem [shape: f32[1,128], index: 2, kind: input, shape index: {}]   ;;  %s3782_s3 = inlined_call_operand.vmem [shape: bf16[128,128], index: 3, kind: input, shape index: {}]   ;;  %s3783_s4 = inlined_call_operand.vmem [shape: f32[1,128], index: 4, kind: input, shape index: {}]   ;;  %s3784_s5 = inlined_call_operand.vmem [shape: bf16[8,128], index: 5, kind: input, shape index: {}]   ;;  %s3785_s6 = inlined_call_operand.vmem [shape: f32[8,1], index: 6, kind: input, shape index: {}]   ;;  %s3786_s7 = inlined_call_operand.vmem [shape: f32[8,2048], index: 7, kind: output, shape index: {}]  }
   0x1 LB: > { %s2482_s25 = sadd.s32 4294967295, %s3089_s24   ;;  %p2486_p0 = scmp.ge.s32.totalorder %s3089_s24, 1  ;;  %s3089_s24 = sphi %s3133_s24, %s17_s24  }
   0x2   : > { %p238_p1 = scmp.lt.s32.totalorder %s3089_s24, 3 }
   0x4   : > { %p239_p2 = pnand %p2486_p0, %p238_p1 }
   0x5   : > { %v3070_v0 = vld [vmem:[%s3780_s1] sm:$0xff] (!%p239_p2)   ;;  %vm695_vm0 = vcmask (!%p239_p2), 1042432   ;;  %v3071_v1 = vld [vmem:[%s3780_s1 + $0x8] sm:$0xff] (!%p239_p2)   ;;  %vm696_vm1 = vcmask (!%p239_p2), 1043456   ;;  %v3072_v2 = vld [vmem:[%s3780_s1 + $0x10] ss:$0 sps:$4 sm:$0xff] (!%p239_p2)  }
   0x6   : > { %242 = sbr.rel (%p239_p2) target bundleno = 967 (0x3c7), region = 48  ;;  %2781 = vmatprep.subr.bf16.mxu0 (!%p239_p2), %v3070_v0  ;;  %s2487_s9 = sshll.u32 (!%p239_p2), %s2482_s25, 7  ;;  %v3091_v3 = vmov (!%p239_p2), 65535   ;;  %vm502_vm2 = vcmask (!%p239_p2), 318464   ;;  %v3073_v30 = vld [vmem:[%s3782_s3] sm:$0xff] (!%p239_p2)   ;;  %v3074_v33 = vld [vmem:[%s3782_s3 + $0x8] sm:$0xff] (!%p239_p2)  }
   0x7   : > { %2782 = vmatpush3.bf16.msra.mxu0 (!%p239_p2), %v3070_v0  ;;  %v697_v4 = vsel (!%p239_p2), %vm695_vm0, 4294967295, %v3091_v3  ;;  %p271_p3 = scmp.lt.s32.totalorder (!%p239_p2), %s2487_s9, 255  ;;  %2915 = vmatprep.subr.bf16.mxu1 (!%p239_p2), %v3073_v30  ;;  %v3075_v36 = vld [vmem:[%s3782_s3 + $0x10] sm:$0xff] (!%p239_p2)   ;;  %v3076_v39 = vld [vmem:[%s3782_s3 + $0x18] sm:$0xff] (!%p239_p2)   ;;  %v3077_v44 = vld [vmem:[%s3782_s3 + $0x20] sm:$0xff] (!%p239_p2)   ;;  %s2489_s21 = sshll.u32 (!%p239_p2), %s2482_s25, 3 }
   0x8   : > { %2783 = vmatprep.subr.bf16.mxu0 (!%p239_p2), %v3071_v1  ;;  %v698_v5 = vsel (!%p239_p2), %vm696_vm1, %v697_v4, 0  ;;  %2916 = vmatpush3.bf16.msra.mxu1 (!%p239_p2), %v3073_v30  ;;  %v3078_v47 = vld [vmem:[%s3782_s3 + $0x28] sm:$0xff] (!%p239_p2)   ;;  %p277_p4 = scmp.lt.s32.totalorder (!%p239_p2), %s2489_s21, 15 }
   0x9   : > { %v700_v6 = vand.u32 (!%p239_p2), %v3072_v2, %v698_v5  ;;  %2917 = vmatprep.subr.bf16.mxu1 (!%p239_p2), %v3074_v33 }
   0xb   : > { %2784 = vmatpush3.bf16.msra.mxu0 (!%p239_p2), %v3071_v1 }
   0xc   : > { %2785 = vmatprep.subr.bf16.mxu0 (!%p239_p2), %v700_v6  ;;  %2918 = vmatpush3.bf16.msra.mxu1 (!%p239_p2), %v3074_v33 }
   0xd   : > { %s3788_s9 = smov (!%p271_p3, %s2487_s9), 255  ;;  %2919 = vmatprep.subr.bf16.mxu1 %v3075_v36  ;;  %s3790_s21 = smov (!%p277_p4, %s2489_s21), 15 }
   0xe   : > { %s2488_s10 = sshll.u32 %s3788_s9, 3  ;;  %s2490_s22 = sshll.u32 %s3790_s21, 3 }
   0xf   : > { %s3155_s13 = scalar_lea.vmem %s3779_s0, %s2488_s10  ;;  %2786 = vmatpush3.bf16.msra.mxu0 %v700_v6  ;;  %s3766_s27 = scalar_lea.vmem %s3786_s7, %s2490_s22 }
  0x10   : > { %v283_v7 = vld [vmem:[%s3155_s13] sm:$0xff]  ;;  %v284_v8 = vld [vmem:[%s3155_s13 + $0x8] sm:$0xff]  ;;  %v285_v9 = vld [vmem:[%s3155_s13 + $0x10] sm:$0xff]  ;;  %2920 = vmatpush3.bf16.msra.mxu1 %v3075_v36 }
  0x11   : > { %v411_v10 = vpack.c.bf16 %v284_v8, %v283_v7  ;;  %v286_v11 = vld [vmem:[%s3155_s13 + $0x18] sm:$0xff]  ;;  %v287_v12 = vld [vmem:[%s3155_s13 + $0x20] sm:$0xff]  ;;  %v288_v13 = vld [vmem:[%s3155_s13 + $0x28] sm:$0xff]  ;;  %2921 = vmatprep.subr.bf16.mxu1 %v3076_v39 }
  0x12   : > { %v412_v14 = vpack.c.bf16 %v286_v11, %v285_v9  ;;  %v413_v15 = vpack.c.bf16 %v288_v13, %v287_v12  ;;  %v289_v16 = vld [vmem:[%s3155_s13 + $0x30] sm:$0xff]  ;;  %v290_v17 = vld [vmem:[%s3155_s13 + $0x38] sm:$0xff]  ;;  %v291_v18 = vld [vmem:[%s3155_s13 + $0x40] sm:$0xff] }
  0x13   : > { %2787 = vmatprep.mubr.msk.bf16.mxu0 %vm502_vm2, %v411_v10  ;;  %v292_v19 = vld [vmem:[%s3155_s13 + $0x48] sm:$0xff]  ;;  %v414_v20 = vpack.c.bf16 %v290_v17, %v289_v16  ;;  %v293_v22 = vld [vmem:[%s3155_s13 + $0x50] sm:$0xff]  ;;  %v294_v23 = vld [vmem:[%s3155_s13 + $0x58] sm:$0xff] }
  0x14   : > { %2788 = vmatmul.mubr.msk.bf16.vlgmr.msra.gmra.mrb[0].mxu0 %vm502_vm2, %v412_v14  ;;  %v415_v21 = vpack.c.bf16 %v292_v19, %v291_v18  ;;  %v295_v24 = vld [vmem:[%s3155_s13 + $0x60] sm:$0xff]  ;;  %v296_v25 = vld [vmem:[%s3155_s13 + $0x68] sm:$0xff]  ;;  %v416_v26 = vpack.c.bf16 %v294_v23, %v293_v22  ;;  %v297_v28 = vld [vmem:[%s3155_s13 + $0x70] sm:$0xff]  ;;  %2922 = vmatpush3.bf16.msra.mxu1 %v3076_v39 }
  0x15   : > { %2791 = vmatprep.mubr.msk.bf16.mxu0 %vm502_vm2, %v413_v15  ;;  %v417_v27 = vpack.c.bf16 %v296_v25, %v295_v24  ;;  %v298_v29 = vld [vmem:[%s3155_s13 + $0x78] sm:$0xff]  ;;  %v299_v31 = vld [vmem:[%s3155_s13 + $0x80] sm:$0xff]  ;;  %v300_v32 = vld [vmem:[%s3155_s13 + $0x88] sm:$0xff]  ;;  %2923 = vmatprep.subr.bf16.mxu1 %v3077_v44 }
  0x16   : > { %v418_v34 = vpack.c.bf16 %v298_v29, %v297_v28  ;;  %v419_v35 = vpack.c.bf16 %v300_v32, %v299_v31  ;;  %v301_v37 = vld [vmem:[%s3155_s13 + $0x90] sm:$0xff]  ;;  %v302_v38 = vld [vmem:[%s3155_s13 + $0x98] sm:$0xff]  ;;  %v303_v40 = vld [vmem:[%s3155_s13 + $0xa0] sm:$0xff] }
  0x17   : > { %v304_v41 = vld [vmem:[%s3155_s13 + $0xa8] sm:$0xff]  ;;  %v420_v42 = vpack.c.bf16 %v302_v38, %v301_v37  ;;  %v305_v45 = vld [vmem:[%s3155_s13 + $0xb0] sm:$0xff]  ;;  %v306_v46 = vld [vmem:[%s3155_s13 + $0xb8] sm:$0xff] }
  0x18   : > { %v421_v43 = vpack.c.bf16 %v304_v41, %v303_v40  ;;  %v307_v48 = vld [vmem:[%s3155_s13 + $0xc0] sm:$0xff]  ;;  %v308_v49 = vld [vmem:[%s3155_s13 + $0xc8] sm:$0xff]  ;;  %v422_v50 = vpack.c.bf16 %v306_v46, %v305_v45  ;;  %2924 = vmatpush3.bf16.msra.mxu1 %v3077_v44  ;;  %v309_v52 = vld [vmem:[%s3155_s13 + $0xd0] sm:$0xff] }
  0x19   : > { %v423_v51 = vpack.c.bf16 %v308_v49, %v307_v48  ;;  %2925 = vmatprep.subr.bf16.mxu1 %v3078_v47  ;;  %v310_v53 = vld [vmem:[%s3155_s13 + $0xd8] sm:$0xff]  ;;  %v311_v54 = vld [vmem:[%s3155_s13 + $0xe0] sm:$0xff]  ;;  %v312_v55 = vld [vmem:[%s3155_s13 + $0xe8] sm:$0xff] }
  0x1a   : > { %v424_v56 = vpack.c.bf16 %v310_v53, %v309_v52  ;;  %v425_v57 = vpack.c.bf16 %v312_v55, %v311_v54  ;;  %v313_v58 = vld [vmem:[%s3155_s13 + $0xf0] sm:$0xff]  ;;  %v314_v59 = vld [vmem:[%s3155_s13 + $0xf8] sm:$0xff]  ;;  %v315_v60 = vld [vmem:[%s3155_s13 + $0x100] sm:$0xff] }
  0x1b   : > { %v316_v61 = vld [vmem:[%s3155_s13 + $0x108] sm:$0xff]  ;;  %v426_v62 = vpack.c.bf16 %v314_v59, %v313_v58  ;;  %v317_v0 = vld [vmem:[%s3155_s13 + $0x110] sm:$0xff]  ;;  %v318_v1 = vld [vmem:[%s3155_s13 + $0x118] sm:$0xff] }
  0x1c   : > { %2792 = vmatmul.mubr.msk.bf16.gmra.mrb[4].mxu0 %vm502_vm2, %v414_v20  ;;  %2926 = vmatpush3.bf16.msra.mxu1 %v3078_v47  ;;  %v427_v63 = vpack.c.bf16 %v316_v61, %v315_v60  ;;  %v319_v2 = vld [vmem:[%s3155_s13 + $0x120] sm:$0xff]  ;;  %v320_v3 = vld [vmem:[%s3155_s13 + $0x128] sm:$0xff]  ;;  %v428_v4 = vpack.c.bf16 %v318_v1, %v317_v0  ;;  %v321_v6 = vld [vmem:[%s3155_s13 + $0x130] sm:$0xff] }
  0x1d   : > { %2795 = vmatprep.mubr.msk.bf16.mxu0 %vm502_vm2, %v415_v21  ;;  %v429_v5 = vpack.c.bf16 %v320_v3, %v319_v2  ;;  %v322_v7 = vld [vmem:[%s3155_s13 + $0x138] sm:$0xff]  ;;  %v323_v8 = vld [vmem:[%s3155_s13 + $0x140] sm:$0xff]  ;;  %v324_v9 = vld [vmem:[%s3155_s13 + $0x148] sm:$0xff] }
  0x1e   : > { %v430_v10 = vpack.c.bf16 %v322_v7, %v321_v6  ;;  %v431_v11 = vpack.c.bf16 %v324_v9, %v323_v8  ;;  %v325_v12 = vld [vmem:[%s3155_s13 + $0x150] sm:$0xff]  ;;  %v326_v13 = vld [vmem:[%s3155_s13 + $0x158] sm:$0xff]  ;;  %v327_v14 = vld [vmem:[%s3155_s13 + $0x160] sm:$0xff] }
  0x1f   : > { %v328_v15 = vld [vmem:[%s3155_s13 + $0x168] sm:$0xff]  ;;  %v432_v16 = vpack.c.bf16 %v326_v13, %v325_v12  ;;  %v329_v18 = vld [vmem:[%s3155_s13 + $0x170] sm:$0xff]  ;;  %v330_v19 = vld [vmem:[%s3155_s13 + $0x178] sm:$0xff] }
  0x20   : > { %v433_v17 = vpack.c.bf16 %v328_v15, %v327_v14  ;;  %v331_v20 = vld [vmem:[%s3155_s13 + $0x180] sm:$0xff]  ;;  %v332_v21 = vld [vmem:[%s3155_s13 + $0x188] sm:$0xff]  ;;  %v434_v22 = vpack.c.bf16 %v330_v19, %v329_v18  ;;  %v3079_v23 = vld [vmem:[%s3782_s3 + $0x30] sm:$0xff]  }
  0x21   : > { %v435_v24 = vpack.c.bf16 %v332_v21, %v331_v20  ;;  %2927 = vmatprep.subr.bf16.mxu1 %v3079_v23  ;;  %v3080_v25 = vld [vmem:[%s3782_s3 + $0x38] sm:$0xff]   ;;  %v335_v28 = vld [vmem:[%s3155_s13 + $0x1a0] sm:$0xff]  ;;  %v336_v29 = vld [vmem:[%s3155_s13 + $0x1a8] sm:$0xff] }
  0x22   : > { %2928 = vmatpush3.bf16.msra.mxu1 %v3079_v23  ;;  %v437_v31 = vpack.c.bf16 %v336_v29, %v335_v28  ;;  %v337_v32 = vld [vmem:[%s3155_s13 + $0x1b0] sm:$0xff]  ;;  %v338_v33 = vld [vmem:[%s3155_s13 + $0x1b8] sm:$0xff]  ;;  %v343_v40 = vld [vmem:[%s3155_s13 + $0x1e0] sm:$0xff] }
  0x23   : > { %2929 = vmatprep.subr.bf16.mxu1 %v3080_v25  ;;  %v438_v36 = vpack.c.bf16 %v338_v33, %v337_v32  ;;  %v341_v38 = vld [vmem:[%s3155_s13 + $0x1d0] sm:$0xff]  ;;  %v342_v39 = vld [vmem:[%s3155_s13 + $0x1d8] sm:$0xff]  ;;  %v344_v41 = vld [vmem:[%s3155_s13 + $0x1e8] sm:$0xff] }
  0x24   : > { %2796 = vmatmul.mubr.msk.bf16.gmra.mrb[8].mxu0 %vm502_vm2, %v416_v26  ;;  %v333_v26 = vld [vmem:[%s3155_s13 + $0x190] sm:$0xff]  ;;  %v346_v45 = vld [vmem:[%s3155_s13 + $0x1f8] sm:$0xff]  ;;  %v347_v46 = vld [vmem:[%s3155_s13 + $0x200] sm:$0xff] }
  0x25   : > { %2799 = vmatprep.mubr.msk.bf16.mxu0 %vm502_vm2, %v417_v27  ;;  %v334_v27 = vld [vmem:[%s3155_s13 + $0x198] sm:$0xff]  ;;  %v345_v44 = vld [vmem:[%s3155_s13 + $0x1f0] sm:$0xff]  ;;  %v348_v47 = vld [vmem:[%s3155_s13 + $0x208] sm:$0xff] }
  0x26   : > { %2930 = vmatpush3.bf16.msra.mxu1 %v3080_v25  ;;  %v436_v30 = vpack.c.bf16 %v334_v27, %v333_v26  ;;  %v442_v48 = vpack.c.bf16 %v346_v45, %v345_v44  ;;  %v443_v49 = vpack.c.bf16 %v348_v47, %v347_v46  ;;  %v351_v52 = vld [vmem:[%s3155_s13 + $0x220] sm:$0xff]  ;;  %v352_v53 = vld [vmem:[%s3155_s13 + $0x228] sm:$0xff]  ;;  %v374_v23 = vld [vmem:[%s3155_s13 + $0x2d8] sm:$0xff] }
  0x27   : > { %v445_v55 = vpack.c.bf16 %v352_v53, %v351_v52  ;;  %v355_v58 = vld [vmem:[%s3155_s13 + $0x240] sm:$0xff]  ;;  %v356_v59 = vld [vmem:[%s3155_s13 + $0x248] sm:$0xff]  ;;  %v377_v28 = vld [vmem:[%s3155_s13 + $0x2f0] sm:$0xff] }
  0x28   : > { %v447_v61 = vpack.c.bf16 %v356_v59, %v355_v58  ;;  %v359_v0 = vld [vmem:[%s3155_s13 + $0x260] sm:$0xff]  ;;  %v360_v1 = vld [vmem:[%s3155_s13 + $0x268] sm:$0xff]  ;;  %v378_v29 = vld [vmem:[%s3155_s13 + $0x2f8] sm:$0xff] }
  0x29   : > { %v449_v3 = vpack.c.bf16 %v360_v1, %v359_v0  ;;  %v363_v6 = vld [vmem:[%s3155_s13 + $0x280] sm:$0xff]  ;;  %v364_v7 = vld [vmem:[%s3155_s13 + $0x288] sm:$0xff]  ;;  %v458_v32 = vpack.c.bf16 %v378_v29, %v377_v28  ;;  %v389_v46 = vld [vmem:[%s3155_s13 + $0x350] sm:$0xff] }
  0x2a   : > { %v451_v9 = vpack.c.bf16 %v364_v7, %v363_v6  ;;  %v367_v12 = vld [vmem:[%s3155_s13 + $0x2a0] sm:$0xff]  ;;  %v368_v13 = vld [vmem:[%s3155_s13 + $0x2a8] sm:$0xff]  ;;  %v390_v47 = vld [vmem:[%s3155_s13 + $0x358] sm:$0xff] }
  0x2b   : > { %v453_v15 = vpack.c.bf16 %v368_v13, %v367_v12  ;;  %v371_v18 = vld [vmem:[%s3155_s13 + $0x2c0] sm:$0xff]  ;;  %v372_v19 = vld [vmem:[%s3155_s13 + $0x2c8] sm:$0xff]  ;;  %v393_v53 = vld [vmem:[%s3155_s13 + $0x370] sm:$0xff] }
  0x2c   : > { %2800 = vmatmul.mubr.msk.bf16.gmra.mrb[12].mxu0 %vm502_vm2, %v418_v34  ;;  %v339_v34 = vld [vmem:[%s3155_s13 + $0x1c0] sm:$0xff]  ;;  %v455_v21 = vpack.c.bf16 %v372_v19, %v371_v18  ;;  %v376_v25 = vld [vmem:[%s3155_s13 + $0x2e8] sm:$0xff]  ;;  %v397_v7 = vld [vmem:[%s3155_s13 + $0x390] sm:$0xff] }
  0x2d   : > { %2803 = vmatprep.mubr.msk.bf16.mxu0 %vm502_vm2, %v419_v35  ;;  %v340_v35 = vld [vmem:[%s3155_s13 + $0x1c8] sm:$0xff]  ;;  %v3348_v52 = vld [vmem:[%s3781_s2] ss:$0 sm:$0xff]  ;;  %v402_v28 = vld [vmem:[%s3155_s13 + $0x3b8] sm:$0xff] }
  0x2e   : > { %v439_v37 = vpack.c.bf16 %v340_v35, %v339_v34  ;;  %v381_v34 = vld [vmem:[%s3155_s13 + $0x310] sm:$0xff]  ;;  %v382_v35 = vld [vmem:[%s3155_s13 + $0x318] sm:$0xff] }
  0x34   : > { %2804 = vmatmul.mubr.msk.bf16.gmra.mrb[16].mxu0 %vm502_vm2, %v420_v42  ;;  %v440_v42 = vpack.c.bf16 %v342_v39, %v341_v38  ;;  %v460_v38 = vpack.c.bf16 %v382_v35, %v381_v34 }
  0x35   : > { %2807 = vmatprep.mubr.msk.bf16.mxu0 %vm502_vm2, %v421_v43  ;;  %v441_v43 = vpack.c.bf16 %v344_v41, %v343_v40  ;;  %v385_v40 = vld [vmem:[%s3155_s13 + $0x330] sm:$0xff]  ;;  %v386_v41 = vld [vmem:[%s3155_s13 + $0x338] sm:$0xff] }
  0x36   : > { %v462_v44 = vpack.c.bf16 %v386_v41, %v385_v40 }
  0x3c   : > { %2808 = vmatmul.mubr.msk.bf16.gmra.mrb[20].mxu0 %vm502_vm2, %v422_v50  ;;  %v349_v50 = vld [vmem:[%s3155_s13 + $0x210] sm:$0xff] }
  0x3d   : > { %2811 = vmatprep.mubr.msk.bf16.mxu0 %vm502_vm2, %v423_v51  ;;  %v350_v51 = vld [vmem:[%s3155_s13 + $0x218] sm:$0xff] }
  0x3e   : > { %v444_v54 = vpack.c.bf16 %v350_v51, %v349_v50  ;;  %v464_v50 = vpack.c.bf16 %v390_v47, %v389_v46  ;;  %v405_v47 = vld [vmem:[%s3155_s13 + $0x3d0] sm:$0xff] }
  0x44   : > { %2812 = vmatmul.mubr.msk.bf16.gmra.mrb[24].mxu0 %vm502_vm2, %v424_v56  ;;  %v353_v56 = vld [vmem:[%s3155_s13 + $0x230] sm:$0xff] }
  0x45   : > { %2815 = vmatprep.mubr.msk.bf16.mxu0 %vm502_vm2, %v425_v57  ;;  %v354_v57 = vld [vmem:[%s3155_s13 + $0x238] sm:$0xff] }
  0x46   : > { %v446_v60 = vpack.c.bf16 %v354_v57, %v353_v56  ;;  %v396_v56 = vld [vmem:[%s3155_s13 + $0x388] sm:$0xff] }
  0x4c   : > { %2816 = vmatmul.mubr.msk.bf16.gmra.mrb[28].mxu0 %vm502_vm2, %v426_v62  ;;  %v357_v62 = vld [vmem:[%s3155_s13 + $0x250] sm:$0xff] }
  0x4d   : > { %2819 = vmatprep.mubr.msk.bf16.mxu0 %vm502_vm2, %v427_v63  ;;  %v358_v63 = vld [vmem:[%s3155_s13 + $0x258] sm:$0xff] }
  0x4e   : > { %v448_v2 = vpack.c.bf16 %v358_v63, %v357_v62 }
  0x54   : > { %2820 = vmatmul.mubr.msk.bf16.gmra.mrb[32].mxu0 %vm502_vm2, %v428_v4  ;;  %v361_v4 = vld [vmem:[%s3155_s13 + $0x270] sm:$0xff] }
  0x55   : > { %2823 = vmatprep.mubr.msk.bf16.mxu0 %vm502_vm2, %v429_v5  ;;  %v362_v5 = vld [vmem:[%s3155_s13 + $0x278] sm:$0xff] }
  0x56   : > { %v450_v8 = vpack.c.bf16 %v362_v5, %v361_v4 }
  0x5c   : > { %2824 = vmatmul.mubr.msk.bf16.gmra.mrb[36].mxu0 %vm502_vm2, %v430_v10  ;;  %v365_v10 = vld [vmem:[%s3155_s13 + $0x290] sm:$0xff] }
  0x5d   : > { %2827 = vmatprep.mubr.msk.bf16.mxu0 %vm502_vm2, %v431_v11  ;;  %v366_v11 = vld [vmem:[%s3155_s13 + $0x298] sm:$0xff] }
  0x5e   : > { %v452_v14 = vpack.c.bf16 %v366_v11, %v365_v10  ;;  %v399_v10 = vld [vmem:[%s3155_s13 + $0x3a0] sm:$0xff]  ;;  %v400_v11 = vld [vmem:[%s3155_s13 + $0x3a8] sm:$0xff] }
  0x5f   : > { %v469_v19 = vpack.c.bf16 %v400_v11, %v399_v10 }
  0x64   : > { %2828 = vmatmul.mubr.msk.bf16.gmra.mrb[40].mxu0 %vm502_vm2, %v432_v16  ;;  %v369_v16 = vld [vmem:[%s3155_s13 + $0x2b0] sm:$0xff] }
  0x65   : > { %2831 = vmatprep.mubr.msk.bf16.mxu0 %vm502_vm2, %v433_v17  ;;  %v370_v17 = vld [vmem:[%s3155_s13 + $0x2b8] sm:$0xff] }
  0x66   : > { %v454_v20 = vpack.c.bf16 %v370_v17, %v369_v16 }
  0x6c   : > { %2832 = vmatmul.mubr.msk.bf16.gmra.mrb[44].mxu0 %vm502_vm2, %v434_v22  ;;  %v373_v22 = vld [vmem:[%s3155_s13 + $0x2d0] sm:$0xff] }
  0x6d   : > { %2835 = vmatprep.mubr.msk.bf16.mxu0 %vm502_vm2, %v435_v24  ;;  %v375_v24 = vld [vmem:[%s3155_s13 + $0x2e0] sm:$0xff]  ;;  %v456_v26 = vpack.c.bf16 %v374_v23, %v373_v22 }
  0x6e   : > { %v457_v27 = vpack.c.bf16 %v376_v25, %v375_v24 }
  0x74   : > { %2836 = vmatmul.mubr.msk.bf16.gmra.mrb[48].mxu0 %vm502_vm2, %v436_v30  ;;  %v379_v30 = vld [vmem:[%s3155_s13 + $0x300] sm:$0xff] }
  0x75   : > { %2839 = vmatprep.mubr.msk.bf16.mxu0 %vm502_vm2, %v437_v31  ;;  %v380_v31 = vld [vmem:[%s3155_s13 + $0x308] sm:$0xff] }
  0x76   : > { %v459_v33 = vpack.c.bf16 %v380_v31, %v379_v30  ;;  %v403_v30 = vld [vmem:[%s3155_s13 + $0x3c0] sm:$0xff]  ;;  %v404_v31 = vld [vmem:[%s3155_s13 + $0x3c8] sm:$0xff] }
  0x7c   : > { %2840 = vmatmul.mubr.msk.bf16.gmra.mrb[52].mxu0 %vm502_vm2, %v438_v36  ;;  %v383_v36 = vld [vmem:[%s3155_s13 + $0x320] sm:$0xff] }
  0x7d   : > { %2843 = vmatprep.mubr.msk.bf16.mxu0 %vm502_vm2, %v439_v37  ;;  %v384_v37 = vld [vmem:[%s3155_s13 + $0x328] sm:$0xff] }
  0x7e   : > { %v461_v39 = vpack.c.bf16 %v384_v37, %v383_v36 }
  0x84   : > { %2844 = vmatmul.mubr.msk.bf16.gmra.mrb[56].mxu0 %vm502_vm2, %v440_v42  ;;  %v387_v42 = vld [vmem:[%s3155_s13 + $0x340] sm:$0xff] }
  0x85   : > { %2847 = vmatprep.mubr.msk.bf16.mxu0 %vm502_vm2, %v441_v43  ;;  %v388_v43 = vld [vmem:[%s3155_s13 + $0x348] sm:$0xff] }
  0x86   : > { %v463_v45 = vpack.c.bf16 %v388_v43, %v387_v42 }
  0x8c   : > { %2848 = vmatmul.mubr.msk.bf16.gmra.mrb[60].mxu0 %vm502_vm2, %v442_v48  ;;  %v391_v48 = vld [vmem:[%s3155_s13 + $0x360] sm:$0xff] }
  0x8d   : > { %2851 = vmatprep.mubr.msk.bf16.mxu0 %vm502_vm2, %v443_v49  ;;  %v392_v49 = vld [vmem:[%s3155_s13 + $0x368] sm:$0xff] }
  0x8e   : > { %v465_v51 = vpack.c.bf16 %v392_v49, %v391_v48  ;;  %v406_v48 = vld [vmem:[%s3155_s13 + $0x3d8] sm:$0xff] }
  0x94   : > { %2852 = vmatmul.mubr.msk.bf16.gmra.mrb[64].mxu0 %vm502_vm2, %v444_v54  ;;  %v394_v54 = vld [vmem:[%s3155_s13 + $0x378] sm:$0xff] }
  0x95   : > { %2855 = vmatprep.mubr.msk.bf16.mxu0 %vm502_vm2, %v445_v55  ;;  %v395_v55 = vld [vmem:[%s3155_s13 + $0x380] sm:$0xff] }
  0x96   : > { %v467_v63 = vpack.c.bf16 %v396_v56, %v395_v55 }
  0x9c   : > { %2856 = vmatmul.mubr.msk.bf16.gmra.mrb[68].mxu0 %vm502_vm2, %v446_v60  ;;  %v466_v60 = vpack.c.bf16 %v394_v54, %v393_v53 }
  0x9d   : > { %2859 = vmatprep.mubr.msk.bf16.mxu0 %vm502_vm2, %v447_v61 }
  0xa4   : > { %2860 = vmatmul.mubr.msk.bf16.gmra.mrb[72].mxu0 %vm502_vm2, %v448_v2 }
  0xa5   : > { %2863 = vmatprep.mubr.msk.bf16.mxu0 %vm502_vm2, %v449_v3 }
  0xac   : > { %2864 = vmatmul.mubr.msk.bf16.gmra.mrb[76].mxu0 %vm502_vm2, %v450_v8  ;;  %v398_v8 = vld [vmem:[%s3155_s13 + $0x398] sm:$0xff] }
  0xad   : > { %2867 = vmatprep.mubr.msk.bf16.mxu0 %vm502_vm2, %v451_v9  ;;  %v468_v16 = vpack.c.bf16 %v398_v8, %v397_v7 }
  0xb4   : > { %2868 = vmatmul.mubr.msk.bf16.gmra.mrb[80].mxu0 %vm502_vm2, %v452_v14 }
  0xb5   : > { %2871 = vmatprep.mubr.msk.bf16.mxu0 %vm502_vm2, %v453_v15 }
  0xbc   : > { %2872 = vmatmul.mubr.msk.bf16.gmra.mrb[84].mxu0 %vm502_vm2, %v454_v20 }
  0xbd   : > { %2875 = vmatprep.mubr.msk.bf16.mxu0 %vm502_vm2, %v455_v21 }
  0xc4   : > { %2876 = vmatmul.mubr.msk.bf16.gmra.mrb[88].mxu0 %vm502_vm2, %v456_v26 }
  0xc5   : > { %2879 = vmatprep.mubr.msk.bf16.mxu0 %vm502_vm2, %v457_v27  ;;  %v401_v27 = vld [vmem:[%s3155_s13 + $0x3b0] sm:$0xff] }
  0xc6   : > { %v470_v36 = vpack.c.bf16 %v402_v28, %v401_v27 }
  0xcc   : > { %2880 = vmatmul.mubr.msk.bf16.gmra.mrb[92].mxu0 %vm502_vm2, %v458_v32 }
  0xcd   : > { %2883 = vmatprep.mubr.msk.bf16.mxu0 %vm502_vm2, %v459_v33 }
  0xd4   : > { %2884 = vmatmul.mubr.msk.bf16.gmra.mrb[96].mxu0 %vm502_vm2, %v460_v38 }
  0xd5   : > { %2887 = vmatprep.mubr.msk.bf16.mxu0 %vm502_vm2, %v461_v39  ;;  %v471_v39 = vpack.c.bf16 %v404_v31, %v403_v30 }
  0xdc   : > { %2888 = vmatmul.mubr.msk.bf16.gmra.mrb[100].mxu0 %vm502_vm2, %v462_v44 }
  0xdd   : > { %2891 = vmatprep.mubr.msk.bf16.mxu0 %vm502_vm2, %v463_v45 }
  0xe4   : > { %2892 = vmatmul.mubr.msk.bf16.gmra.mrb[104].mxu0 %vm502_vm2, %v464_v50  ;;  %v407_v50 = vld [vmem:[%s3155_s13 + $0x3e0] sm:$0xff] }
  0xe5   : > { %2895 = vmatprep.mubr.msk.bf16.mxu0 %vm502_vm2, %v465_v51  ;;  %v408_v51 = vld [vmem:[%s3155_s13 + $0x3e8] sm:$0xff] }
  0xe7   : > { %v2789_v57 = vpop.f32.mrb[0].mxu0 }
  0xe8   : > { %v745_v58 = vadd.f32 %v2789_v57, %v3348_v52  ;;  %v736_v59 = vpop.f32.mrb[1].mxu0  ;;  %v472_v57 = vpack.c.bf16 %v406_v48, %v405_v47 }
  0xe9   : > { %v737_v61 = vadd.f32 %v3348_v52, %v736_v59  ;;  %v2790_v62 = vpop.f32.mrb[2].mxu0 }
  0xea   : > { %v748_v0 = vadd.f32 %v2790_v62, %v3348_v52  ;;  %v739_v1 = vpop.f32.mrb[3].mxu0  ;;  %v1249_v3 = vmax.f32 %v745_v58, 0.0 }
  0xeb   : > { %v740_v2 = vadd.f32 %v3348_v52, %v739_v1  ;;  %v1247_v5 = vmax.f32 %v737_v61, 0.0 }
  0xec   : > { %v1250_v4 = vmax.f32 %v748_v0, 0.0  ;;  %2896 = vmatmul.mubr.msk.bf16.gmra.mrb[108].mxu0 %vm502_vm2, %v466_v60  ;;  %v473_v60 = vpack.c.bf16 %v408_v51, %v407_v50 }
  0xed   : > { %v1248_v6 = vmax.f32 %v740_v2, 0.0  ;;  %2899 = vmatprep.mubr.msk.bf16.mxu0 %vm502_vm2, %v467_v63 }
  0xee   : > { %v1376_v9 = vpack.c.bf16 %v1250_v4, %v1249_v3  ;;  %v409_v4 = vld [vmem:[%s3155_s13 + $0x3f0] sm:$0xff] }
  0xef   : > { %v2793_v12 = vpop.f32.mrb[4].mxu0  ;;  %v1375_v13 = vpack.c.bf16 %v1248_v6, %v1247_v5  ;;  %v410_v5 = vld [vmem:[%s3155_s13 + $0x3f8] sm:$0xff] }
  0xf0   : > { %v761_v14 = vadd.f32 %v2793_v12, %v3348_v52  ;;  %v752_v15 = vpop.f32.mrb[5].mxu0  ;;  %v474_v11 = vpack.c.bf16 %v410_v5, %v409_v4 }
  0xf1   : > { %v753_v17 = vadd.f32 %v3348_v52, %v752_v15  ;;  %v2794_v18 = vpop.f32.mrb[6].mxu0  ;;  %2931 = vmatprep.mubr.bf16.mxu1 %v1375_v13 }
  0xf2   : > { %v764_v20 = vadd.f32 %v2794_v18, %v3348_v52  ;;  %v755_v21 = vpop.f32.mrb[7].mxu0  ;;  %2932 = vmatmul.mubr.bf16.vlgmr.msra.gmra.mrb[0].mxu1 %v1376_v9  ;;  %v1253_v23 = vmax.f32 %v761_v14, 0.0 }
  0xf3   : > { %v756_v22 = vadd.f32 %v3348_v52, %v755_v21  ;;  %v1251_v25 = vmax.f32 %v753_v17, 0.0 }
  0xf4   : > { %v1254_v24 = vmax.f32 %v764_v20, 0.0  ;;  %2900 = vmatmul.mubr.msk.bf16.gmra.mrb[112].mxu0 %vm502_vm2, %v468_v16 }
  0xf5   : > { %v1252_v26 = vmax.f32 %v756_v22, 0.0  ;;  %2903 = vmatprep.mubr.msk.bf16.mxu0 %vm502_vm2, %v469_v19 }
  0xf6   : > { %v1378_v29 = vpack.c.bf16 %v1254_v24, %v1253_v23 }
  0xf7   : > { %v1377_v32 = vpack.c.bf16 %v1252_v26, %v1251_v25  ;;  %v2797_v33 = vpop.f32.mrb[8].mxu0 }
  0xf8   : > { %v777_v34 = vadd.f32 %v2797_v33, %v3348_v52  ;;  %v768_v35 = vpop.f32.mrb[9].mxu0 }
  0xf9   : > { %v769_v37 = vadd.f32 %v3348_v52, %v768_v35  ;;  %v2798_v38 = vpop.f32.mrb[10].mxu0  ;;  %2935 = vmatprep.mubr.bf16.mxu1 %v1377_v32 }
  0xfa   : > { %v780_v40 = vadd.f32 %v2798_v38, %v3348_v52  ;;  %v771_v41 = vpop.f32.mrb[11].mxu0  ;;  %2936 = vmatmul.mubr.bf16.gmra.mrb[4].mxu1 %v1378_v29  ;;  %v1257_v43 = vmax.f32 %v777_v34, 0.0 }
  0xfb   : > { %v772_v42 = vadd.f32 %v3348_v52, %v771_v41  ;;  %v1255_v45 = vmax.f32 %v769_v37, 0.0 }
  0xfc   : > { %v1258_v44 = vmax.f32 %v780_v40, 0.0  ;;  %2904 = vmatmul.mubr.msk.bf16.gmra.mrb[116].mxu0 %vm502_vm2, %v470_v36 }
  0xfd   : > { %v1256_v46 = vmax.f32 %v772_v42, 0.0  ;;  %2907 = vmatprep.mubr.msk.bf16.mxu0 %vm502_vm2, %v471_v39 }
  0xfe   : > { %v1380_v49 = vpack.c.bf16 %v1258_v44, %v1257_v43 }
  0xff   : > { %v1379_v53 = vpack.c.bf16 %v1256_v46, %v1255_v45  ;;  %v2801_v54 = vpop.f32.mrb[12].mxu0 }
 0x100   : > { %v793_v55 = vadd.f32 %v2801_v54, %v3348_v52  ;;  %v784_v56 = vpop.f32.mrb[13].mxu0 }
 0x101   : > { %v785_v58 = vadd.f32 %v3348_v52, %v784_v56  ;;  %v2802_v59 = vpop.f32.mrb[14].mxu0  ;;  %2939 = vmatprep.mubr.bf16.mxu1 %v1379_v53 }
 0x102   : > { %v796_v61 = vadd.f32 %v2802_v59, %v3348_v52  ;;  %v787_v62 = vpop.f32.mrb[15].mxu0  ;;  %2940 = vmatmul.mubr.bf16.gmra.mrb[8].mxu1 %v1380_v49  ;;  %v1261_v0 = vmax.f32 %v793_v55, 0.0 }
 0x103   : > { %v788_v63 = vadd.f32 %v3348_v52, %v787_v62  ;;  %v1259_v2 = vmax.f32 %v785_v58, 0.0 }
 0x104   : > { %v1262_v1 = vmax.f32 %v796_v61, 0.0  ;;  %2908 = vmatmul.mubr.msk.bf16.gmra.mrb[120].mxu0 %vm502_vm2, %v472_v57 }
 0x105   : > { %v1260_v3 = vmax.f32 %v788_v63, 0.0  ;;  %2911 = vmatprep.mubr.msk.bf16.mxu0 %vm502_vm2, %v473_v60 }
 0x106   : > { %v1382_v6 = vpack.c.bf16 %v1262_v1, %v1261_v0 }
 0x107   : > { %v1381_v7 = vpack.c.bf16 %v1260_v3, %v1259_v2  ;;  %v2805_v8 = vpop.f32.mrb[16].mxu0 }
 0x108   : > { %v809_v9 = vadd.f32 %v2805_v8, %v3348_v52  ;;  %v800_v10 = vpop.f32.mrb[17].mxu0 }
 0x109   : > { %v801_v12 = vadd.f32 %v3348_v52, %v800_v10  ;;  %v2806_v13 = vpop.f32.mrb[18].mxu0  ;;  %2943 = vmatprep.mubr.bf16.mxu1 %v1381_v7 }
 0x10a   : > { %v812_v14 = vadd.f32 %v2806_v13, %v3348_v52  ;;  %v803_v15 = vpop.f32.mrb[19].mxu0  ;;  %2944 = vmatmul.mubr.bf16.gmra.mrb[12].mxu1 %v1382_v6  ;;  %v1265_v17 = vmax.f32 %v809_v9, 0.0 }
 0x10b   : > { %v804_v16 = vadd.f32 %v3348_v52, %v803_v15  ;;  %v1263_v19 = vmax.f32 %v801_v12, 0.0 }
 0x10c   : > { %v1266_v18 = vmax.f32 %v812_v14, 0.0  ;;  %2912 = vmatmul.mubr.msk.bf16.gmra.mrb[124].mxu0 %vm502_vm2, %v474_v11 }
 0x10d   : > { %v1264_v20 = vmax.f32 %v804_v16, 0.0 }
 0x10e   : > { %v1384_v21 = vpack.c.bf16 %v1266_v18, %v1265_v17 }
 0x10f   : > { %v1383_v22 = vpack.c.bf16 %v1264_v20, %v1263_v19  ;;  %v2809_v23 = vpop.f32.mrb[20].mxu0 }
 0x110   : > { %v825_v24 = vadd.f32 %v2809_v23, %v3348_v52  ;;  %v816_v25 = vpop.f32.mrb[21].mxu0 }
 0x111   : > { %v817_v26 = vadd.f32 %v3348_v52, %v816_v25  ;;  %v2810_v27 = vpop.f32.mrb[22].mxu0  ;;  %2947 = vmatprep.mubr.bf16.mxu1 %v1383_v22 }
 0x112   : > { %v828_v28 = vadd.f32 %v2810_v27, %v3348_v52  ;;  %v819_v29 = vpop.f32.mrb[23].mxu0  ;;  %2948 = vmatmul.mubr.bf16.gmra.mrb[16].mxu1 %v1384_v21  ;;  %v1269_v31 = vmax.f32 %v825_v24, 0.0 }
 0x113   : > { %v820_v30 = vadd.f32 %v3348_v52, %v819_v29  ;;  %v1267_v33 = vmax.f32 %v817_v26, 0.0 }
 0x114   : > { %v1270_v32 = vmax.f32 %v828_v28, 0.0 }
 0x115   : > { %v1268_v34 = vmax.f32 %v820_v30, 0.0 }
 0x116   : > { %v1386_v35 = vpack.c.bf16 %v1270_v32, %v1269_v31 }
 0x117   : > { %v1385_v36 = vpack.c.bf16 %v1268_v34, %v1267_v33  ;;  %v2813_v37 = vpop.f32.mrb[24].mxu0 }
 0x118   : > { %v841_v38 = vadd.f32 %v2813_v37, %v3348_v52  ;;  %v832_v39 = vpop.f32.mrb[25].mxu0 }
 0x119   : > { %v833_v40 = vadd.f32 %v3348_v52, %v832_v39  ;;  %v2814_v41 = vpop.f32.mrb[26].mxu0  ;;  %2951 = vmatprep.mubr.bf16.mxu1 %v1385_v36 }
 0x11a   : > { %v844_v42 = vadd.f32 %v2814_v41, %v3348_v52  ;;  %v835_v43 = vpop.f32.mrb[27].mxu0  ;;  %2952 = vmatmul.mubr.bf16.gmra.mrb[20].mxu1 %v1386_v35  ;;  %v1273_v45 = vmax.f32 %v841_v38, 0.0 }
 0x11b   : > { %v836_v44 = vadd.f32 %v3348_v52, %v835_v43  ;;  %v1271_v47 = vmax.f32 %v833_v40, 0.0 }
 0x11c   : > { %v1274_v46 = vmax.f32 %v844_v42, 0.0 }
 0x11d   : > { %v1272_v48 = vmax.f32 %v836_v44, 0.0 }
 0x11e   : > { %v1388_v49 = vpack.c.bf16 %v1274_v46, %v1273_v45 }
 0x11f   : > { %v1387_v50 = vpack.c.bf16 %v1272_v48, %v1271_v47  ;;  %v2817_v51 = vpop.f32.mrb[28].mxu0 }
 0x120   : > { %v857_v53 = vadd.f32 %v2817_v51, %v3348_v52  ;;  %v848_v54 = vpop.f32.mrb[29].mxu0 }
 0x121   : > { %v849_v55 = vadd.f32 %v3348_v52, %v848_v54  ;;  %v2818_v56 = vpop.f32.mrb[30].mxu0  ;;  %2955 = vmatprep.mubr.bf16.mxu1 %v1387_v50 }
 0x122   : > { %v860_v57 = vadd.f32 %v2818_v56, %v3348_v52  ;;  %v851_v58 = vpop.f32.mrb[31].mxu0  ;;  %2956 = vmatmul.mubr.bf16.gmra.mrb[24].mxu1 %v1388_v49  ;;  %v1277_v60 = vmax.f32 %v857_v53, 0.0 }
 0x123   : > { %v852_v59 = vadd.f32 %v3348_v52, %v851_v58  ;;  %v1275_v62 = vmax.f32 %v849_v55, 0.0 }
 0x124   : > { %v1278_v61 = vmax.f32 %v860_v57, 0.0 }
 0x125   : > { %v1276_v63 = vmax.f32 %v852_v59, 0.0 }
 0x126   : > { %v1390_v0 = vpack.c.bf16 %v1278_v61, %v1277_v60 }
 0x127   : > { %v1389_v1 = vpack.c.bf16 %v1276_v63, %v1275_v62  ;;  %v2821_v2 = vpop.f32.mrb[32].mxu0 }
 0x128   : > { %v873_v3 = vadd.f32 %v2821_v2, %v3348_v52  ;;  %v864_v4 = vpop.f32.mrb[33].mxu0 }
 0x129   : > { %v865_v5 = vadd.f32 %v3348_v52, %v864_v4  ;;  %v2822_v6 = vpop.f32.mrb[34].mxu0  ;;  %2959 = vmatprep.mubr.bf16.mxu1 %v1389_v1 }
 0x12a   : > { %v876_v7 = vadd.f32 %v2822_v6, %v3348_v52  ;;  %v867_v8 = vpop.f32.mrb[35].mxu0  ;;  %2960 = vmatmul.mubr.bf16.gmra.mrb[28].mxu1 %v1390_v0  ;;  %v1281_v10 = vmax.f32 %v873_v3, 0.0 }
 0x12b   : > { %v868_v9 = vadd.f32 %v3348_v52, %v867_v8  ;;  %v1279_v12 = vmax.f32 %v865_v5, 0.0 }
 0x12c   : > { %v1282_v11 = vmax.f32 %v876_v7, 0.0 }
 0x12d   : > { %v1280_v13 = vmax.f32 %v868_v9, 0.0 }
 0x12e   : > { %v1392_v14 = vpack.c.bf16 %v1282_v11, %v1281_v10 }
 0x12f   : > { %v1391_v15 = vpack.c.bf16 %v1280_v13, %v1279_v12  ;;  %v2825_v16 = vpop.f32.mrb[36].mxu0 }
 0x130   : > { %v889_v17 = vadd.f32 %v2825_v16, %v3348_v52  ;;  %v880_v18 = vpop.f32.mrb[37].mxu0 }
 0x131   : > { %v881_v19 = vadd.f32 %v3348_v52, %v880_v18  ;;  %v2826_v20 = vpop.f32.mrb[38].mxu0  ;;  %2963 = vmatprep.mubr.bf16.mxu1 %v1391_v15 }
 0x132   : > { %v892_v21 = vadd.f32 %v2826_v20, %v3348_v52  ;;  %v883_v22 = vpop.f32.mrb[39].mxu0  ;;  %2964 = vmatmul.mubr.bf16.gmra.mrb[32].mxu1 %v1392_v14  ;;  %v1285_v24 = vmax.f32 %v889_v17, 0.0 }
 0x133   : > { %v884_v23 = vadd.f32 %v3348_v52, %v883_v22  ;;  %v1283_v26 = vmax.f32 %v881_v19, 0.0 }
 0x134   : > { %v1286_v25 = vmax.f32 %v892_v21, 0.0 }
 0x135   : > { %v1284_v27 = vmax.f32 %v884_v23, 0.0 }
 0x136   : > { %v1394_v28 = vpack.c.bf16 %v1286_v25, %v1285_v24 }
 0x137   : > { %v1393_v29 = vpack.c.bf16 %v1284_v27, %v1283_v26  ;;  %v2829_v30 = vpop.f32.mrb[40].mxu0 }
 0x138   : > { %v905_v31 = vadd.f32 %v2829_v30, %v3348_v52  ;;  %v896_v32 = vpop.f32.mrb[41].mxu0 }
 0x139   : > { %v897_v33 = vadd.f32 %v3348_v52, %v896_v32  ;;  %v2830_v34 = vpop.f32.mrb[42].mxu0  ;;  %2967 = vmatprep.mubr.bf16.mxu1 %v1393_v29 }
 0x13a   : > { %v908_v35 = vadd.f32 %v2830_v34, %v3348_v52  ;;  %v899_v36 = vpop.f32.mrb[43].mxu0  ;;  %2968 = vmatmul.mubr.bf16.gmra.mrb[36].mxu1 %v1394_v28  ;;  %v1289_v38 = vmax.f32 %v905_v31, 0.0 }
 0x13b   : > { %v900_v37 = vadd.f32 %v3348_v52, %v899_v36  ;;  %v1287_v40 = vmax.f32 %v897_v33, 0.0 }
 0x13c   : > { %v1290_v39 = vmax.f32 %v908_v35, 0.0 }
 0x13d   : > { %v1288_v41 = vmax.f32 %v900_v37, 0.0 }
 0x13e   : > { %v1396_v42 = vpack.c.bf16 %v1290_v39, %v1289_v38 }
 0x13f   : > { %v1395_v43 = vpack.c.bf16 %v1288_v41, %v1287_v40  ;;  %v2833_v44 = vpop.f32.mrb[44].mxu0 }
 0x140   : > { %v921_v45 = vadd.f32 %v2833_v44, %v3348_v52  ;;  %v912_v46 = vpop.f32.mrb[45].mxu0 }
 0x141   : > { %v913_v47 = vadd.f32 %v3348_v52, %v912_v46  ;;  %v2834_v48 = vpop.f32.mrb[46].mxu0  ;;  %2971 = vmatprep.mubr.bf16.mxu1 %v1395_v43 }
 0x142   : > { %v924_v49 = vadd.f32 %v2834_v48, %v3348_v52  ;;  %v915_v50 = vpop.f32.mrb[47].mxu0  ;;  %2972 = vmatmul.mubr.bf16.gmra.mrb[40].mxu1 %v1396_v42  ;;  %v1293_v53 = vmax.f32 %v921_v45, 0.0 }
 0x143   : > { %v916_v51 = vadd.f32 %v3348_v52, %v915_v50  ;;  %v1291_v55 = vmax.f32 %v913_v47, 0.0 }
 0x144   : > { %v1294_v54 = vmax.f32 %v924_v49, 0.0 }
 0x145   : > { %v1292_v56 = vmax.f32 %v916_v51, 0.0 }
 0x146   : > { %v1398_v57 = vpack.c.bf16 %v1294_v54, %v1293_v53 }
 0x147   : > { %v1397_v58 = vpack.c.bf16 %v1292_v56, %v1291_v55  ;;  %v2837_v59 = vpop.f32.mrb[48].mxu0 }
 0x148   : > { %v937_v60 = vadd.f32 %v2837_v59, %v3348_v52  ;;  %v928_v61 = vpop.f32.mrb[49].mxu0 }
 0x149   : > { %v929_v62 = vadd.f32 %v3348_v52, %v928_v61  ;;  %v2838_v63 = vpop.f32.mrb[50].mxu0  ;;  %2975 = vmatprep.mubr.bf16.mxu1 %v1397_v58 }
 0x14a   : > { %v940_v0 = vadd.f32 %v2838_v63, %v3348_v52  ;;  %v931_v1 = vpop.f32.mrb[51].mxu0  ;;  %2976 = vmatmul.mubr.bf16.gmra.mrb[44].mxu1 %v1398_v57  ;;  %v1297_v3 = vmax.f32 %v937_v60, 0.0 }
 0x14b   : > { %v932_v2 = vadd.f32 %v3348_v52, %v931_v1  ;;  %v1295_v5 = vmax.f32 %v929_v62, 0.0 }
 0x14c   : > { %v1298_v4 = vmax.f32 %v940_v0, 0.0 }
 0x14d   : > { %v1296_v6 = vmax.f32 %v932_v2, 0.0 }
 0x14e   : > { %v1400_v7 = vpack.c.bf16 %v1298_v4, %v1297_v3 }
 0x14f   : > { %v1399_v8 = vpack.c.bf16 %v1296_v6, %v1295_v5  ;;  %v2841_v9 = vpop.f32.mrb[52].mxu0 }
 0x150   : > { %v953_v10 = vadd.f32 %v2841_v9, %v3348_v52  ;;  %v944_v11 = vpop.f32.mrb[53].mxu0 }
 0x151   : > { %2979 = vmatprep.mubr.bf16.mxu1 %v1399_v8  ;;  %v945_v12 = vadd.f32 %v3348_v52, %v944_v11  ;;  %v2842_v13 = vpop.f32.mrb[54].mxu0 }
 0x152   : > { %2980 = vmatmul.mubr.bf16.gmra.mrb[48].mxu1 %v1400_v7  ;;  %v956_v14 = vadd.f32 %v2842_v13, %v3348_v52  ;;  %v947_v15 = vpop.f32.mrb[55].mxu0  ;;  %v1301_v17 = vmax.f32 %v953_v10, 0.0 }
 0x153   : > { %v948_v16 = vadd.f32 %v3348_v52, %v947_v15  ;;  %v1299_v19 = vmax.f32 %v945_v12, 0.0 }
 0x154   : > { %v1302_v18 = vmax.f32 %v956_v14, 0.0 }
 0x155   : > { %v1300_v20 = vmax.f32 %v948_v16, 0.0 }
 0x156   : > { %v1402_v21 = vpack.c.bf16 %v1302_v18, %v1301_v17 }
 0x157   : > { %v1401_v22 = vpack.c.bf16 %v1300_v20, %v1299_v19  ;;  %v2845_v23 = vpop.f32.mrb[56].mxu0 }
 0x158   : > { %v969_v24 = vadd.f32 %v2845_v23, %v3348_v52  ;;  %v960_v25 = vpop.f32.mrb[57].mxu0 }
 0x159   : > { %2983 = vmatprep.mubr.bf16.mxu1 %v1401_v22  ;;  %v961_v26 = vadd.f32 %v3348_v52, %v960_v25  ;;  %v2846_v27 = vpop.f32.mrb[58].mxu0 }
 0x15a   : > { %2984 = vmatmul.mubr.bf16.gmra.mrb[52].mxu1 %v1402_v21  ;;  %v972_v28 = vadd.f32 %v2846_v27, %v3348_v52  ;;  %v963_v29 = vpop.f32.mrb[59].mxu0  ;;  %v1305_v31 = vmax.f32 %v969_v24, 0.0 }
 0x15b   : > { %v964_v30 = vadd.f32 %v3348_v52, %v963_v29  ;;  %v1303_v33 = vmax.f32 %v961_v26, 0.0 }
 0x15c   : > { %v1306_v32 = vmax.f32 %v972_v28, 0.0 }
 0x15d   : > { %v1304_v34 = vmax.f32 %v964_v30, 0.0 }
 0x15e   : > { %v1404_v35 = vpack.c.bf16 %v1306_v32, %v1305_v31 }
 0x15f   : > { %v1403_v36 = vpack.c.bf16 %v1304_v34, %v1303_v33  ;;  %v2849_v37 = vpop.f32.mrb[60].mxu0 }
 0x160   : > { %v985_v38 = vadd.f32 %v2849_v37, %v3348_v52  ;;  %v976_v39 = vpop.f32.mrb[61].mxu0 }
 0x161   : > { %2987 = vmatprep.mubr.bf16.mxu1 %v1403_v36  ;;  %v977_v40 = vadd.f32 %v3348_v52, %v976_v39  ;;  %v2850_v41 = vpop.f32.mrb[62].mxu0 }
 0x162   : > { %2988 = vmatmul.mubr.bf16.gmra.mrb[56].mxu1 %v1404_v35  ;;  %v988_v42 = vadd.f32 %v2850_v41, %v3348_v52  ;;  %v979_v43 = vpop.f32.mrb[63].mxu0  ;;  %v1309_v45 = vmax.f32 %v985_v38, 0.0 }
 0x163   : > { %v980_v44 = vadd.f32 %v3348_v52, %v979_v43  ;;  %v1307_v47 = vmax.f32 %v977_v40, 0.0 }
 0x164   : > { %v1310_v46 = vmax.f32 %v988_v42, 0.0 }
 0x165   : > { %v1308_v48 = vmax.f32 %v980_v44, 0.0 }
 0x166   : > { %v1406_v49 = vpack.c.bf16 %v1310_v46, %v1309_v45 }
 0x167   : > { %v1405_v50 = vpack.c.bf16 %v1308_v48, %v1307_v47  ;;  %v2853_v51 = vpop.f32.mrb[64].mxu0 }
 0x168   : > { %v1001_v53 = vadd.f32 %v2853_v51, %v3348_v52  ;;  %v992_v54 = vpop.f32.mrb[65].mxu0 }
 0x169   : > { %2991 = vmatprep.mubr.bf16.mxu1 %v1405_v50  ;;  %v993_v55 = vadd.f32 %v3348_v52, %v992_v54  ;;  %v2854_v56 = vpop.f32.mrb[66].mxu0 }
 0x16a   : > { %2992 = vmatmul.mubr.bf16.gmra.mrb[60].mxu1 %v1406_v49  ;;  %v1004_v57 = vadd.f32 %v2854_v56, %v3348_v52  ;;  %v995_v58 = vpop.f32.mrb[67].mxu0  ;;  %v1313_v60 = vmax.f32 %v1001_v53, 0.0 }
 0x16b   : > { %v996_v59 = vadd.f32 %v3348_v52, %v995_v58  ;;  %v1311_v62 = vmax.f32 %v993_v55, 0.0 }
 0x16c   : > { %v1314_v61 = vmax.f32 %v1004_v57, 0.0 }
 0x16d   : > { %v1312_v63 = vmax.f32 %v996_v59, 0.0 }
 0x16e   : > { %v1408_v0 = vpack.c.bf16 %v1314_v61, %v1313_v60 }
 0x16f   : > { %v1407_v1 = vpack.c.bf16 %v1312_v63, %v1311_v62  ;;  %v2857_v2 = vpop.f32.mrb[68].mxu0 }
 0x170   : > { %v1017_v3 = vadd.f32 %v2857_v2, %v3348_v52  ;;  %v1008_v4 = vpop.f32.mrb[69].mxu0 }
 0x171   : > { %v1009_v5 = vadd.f32 %v3348_v52, %v1008_v4  ;;  %v2858_v6 = vpop.f32.mrb[70].mxu0  ;;  %2995 = vmatprep.mubr.bf16.mxu1 %v1407_v1 }
 0x172   : > { %v1020_v7 = vadd.f32 %v2858_v6, %v3348_v52  ;;  %v1011_v8 = vpop.f32.mrb[71].mxu0  ;;  %2996 = vmatmul.mubr.bf16.gmra.mrb[64].mxu1 %v1408_v0  ;;  %v1317_v10 = vmax.f32 %v1017_v3, 0.0 }
 0x173   : > { %v1012_v9 = vadd.f32 %v3348_v52, %v1011_v8  ;;  %v1315_v12 = vmax.f32 %v1009_v5, 0.0 }
 0x174   : > { %v1318_v11 = vmax.f32 %v1020_v7, 0.0 }
 0x175   : > { %v1316_v13 = vmax.f32 %v1012_v9, 0.0 }
 0x176   : > { %v1410_v14 = vpack.c.bf16 %v1318_v11, %v1317_v10 }
 0x177   : > { %v1409_v15 = vpack.c.bf16 %v1316_v13, %v1315_v12  ;;  %v2861_v16 = vpop.f32.mrb[72].mxu0 }
 0x178   : > { %v1033_v17 = vadd.f32 %v2861_v16, %v3348_v52  ;;  %v1024_v18 = vpop.f32.mrb[73].mxu0 }
 0x179   : > { %v1025_v19 = vadd.f32 %v3348_v52, %v1024_v18  ;;  %v2862_v20 = vpop.f32.mrb[74].mxu0  ;;  %2999 = vmatprep.mubr.bf16.mxu1 %v1409_v15 }
 0x17a   : > { %v1036_v21 = vadd.f32 %v2862_v20, %v3348_v52  ;;  %v1027_v22 = vpop.f32.mrb[75].mxu0  ;;  %3000 = vmatmul.mubr.bf16.gmra.mrb[68].mxu1 %v1410_v14  ;;  %v1321_v24 = vmax.f32 %v1033_v17, 0.0 }
 0x17b   : > { %v1028_v23 = vadd.f32 %v3348_v52, %v1027_v22  ;;  %v1319_v26 = vmax.f32 %v1025_v19, 0.0 }
 0x17c   : > { %v1322_v25 = vmax.f32 %v1036_v21, 0.0 }
 0x17d   : > { %v1320_v27 = vmax.f32 %v1028_v23, 0.0 }
 0x17e   : > { %v1412_v28 = vpack.c.bf16 %v1322_v25, %v1321_v24 }
 0x17f   : > { %v1411_v29 = vpack.c.bf16 %v1320_v27, %v1319_v26  ;;  %v2865_v30 = vpop.f32.mrb[76].mxu0 }
 0x180   : > { %v1049_v31 = vadd.f32 %v2865_v30, %v3348_v52  ;;  %v1040_v32 = vpop.f32.mrb[77].mxu0 }
 0x181   : > { %v1041_v33 = vadd.f32 %v3348_v52, %v1040_v32  ;;  %v2866_v34 = vpop.f32.mrb[78].mxu0  ;;  %3003 = vmatprep.mubr.bf16.mxu1 %v1411_v29 }
 0x182   : > { %v1052_v35 = vadd.f32 %v2866_v34, %v3348_v52  ;;  %v1043_v36 = vpop.f32.mrb[79].mxu0  ;;  %3004 = vmatmul.mubr.bf16.gmra.mrb[72].mxu1 %v1412_v28  ;;  %v1325_v38 = vmax.f32 %v1049_v31, 0.0 }
 0x183   : > { %v1044_v37 = vadd.f32 %v3348_v52, %v1043_v36  ;;  %v1323_v40 = vmax.f32 %v1041_v33, 0.0 }
 0x184   : > { %v1326_v39 = vmax.f32 %v1052_v35, 0.0 }
 0x185   : > { %v1324_v41 = vmax.f32 %v1044_v37, 0.0 }
 0x186   : > { %v1414_v42 = vpack.c.bf16 %v1326_v39, %v1325_v38 }
 0x187   : > { %v1413_v43 = vpack.c.bf16 %v1324_v41, %v1323_v40  ;;  %v2869_v44 = vpop.f32.mrb[80].mxu0 }
 0x188   : > { %v1065_v45 = vadd.f32 %v2869_v44, %v3348_v52  ;;  %v1056_v46 = vpop.f32.mrb[81].mxu0 }
 0x189   : > { %v1057_v47 = vadd.f32 %v3348_v52, %v1056_v46  ;;  %v2870_v48 = vpop.f32.mrb[82].mxu0  ;;  %3007 = vmatprep.mubr.bf16.mxu1 %v1413_v43 }
 0x18a   : > { %v1068_v49 = vadd.f32 %v2870_v48, %v3348_v52  ;;  %v1059_v50 = vpop.f32.mrb[83].mxu0  ;;  %3008 = vmatmul.mubr.bf16.gmra.mrb[76].mxu1 %v1414_v42  ;;  %v1329_v53 = vmax.f32 %v1065_v45, 0.0 }
 0x18b   : > { %v1060_v51 = vadd.f32 %v3348_v52, %v1059_v50  ;;  %v1327_v55 = vmax.f32 %v1057_v47, 0.0 }
 0x18c   : > { %v1330_v54 = vmax.f32 %v1068_v49, 0.0 }
 0x18d   : > { %v1328_v56 = vmax.f32 %v1060_v51, 0.0 }
 0x18e   : > { %v1416_v57 = vpack.c.bf16 %v1330_v54, %v1329_v53 }
 0x18f   : > { %v1415_v58 = vpack.c.bf16 %v1328_v56, %v1327_v55  ;;  %v2873_v59 = vpop.f32.mrb[84].mxu0 }
 0x190   : > { %v1081_v60 = vadd.f32 %v2873_v59, %v3348_v52  ;;  %v1072_v61 = vpop.f32.mrb[85].mxu0 }
 0x191   : > { %v1073_v62 = vadd.f32 %v3348_v52, %v1072_v61  ;;  %v2874_v63 = vpop.f32.mrb[86].mxu0  ;;  %3011 = vmatprep.mubr.bf16.mxu1 %v1415_v58 }
 0x192   : > { %v1084_v0 = vadd.f32 %v2874_v63, %v3348_v52  ;;  %v1075_v1 = vpop.f32.mrb[87].mxu0  ;;  %3012 = vmatmul.mubr.bf16.gmra.mrb[80].mxu1 %v1416_v57  ;;  %v1333_v3 = vmax.f32 %v1081_v60, 0.0 }
 0x193   : > { %v1076_v2 = vadd.f32 %v3348_v52, %v1075_v1  ;;  %v1331_v5 = vmax.f32 %v1073_v62, 0.0 }
 0x194   : > { %v1334_v4 = vmax.f32 %v1084_v0, 0.0 }
 0x195   : > { %v1332_v6 = vmax.f32 %v1076_v2, 0.0 }
 0x196   : > { %v1418_v7 = vpack.c.bf16 %v1334_v4, %v1333_v3 }
 0x197   : > { %v1417_v8 = vpack.c.bf16 %v1332_v6, %v1331_v5  ;;  %v2877_v9 = vpop.f32.mrb[88].mxu0 }
 0x198   : > { %v1097_v10 = vadd.f32 %v2877_v9, %v3348_v52  ;;  %v1088_v11 = vpop.f32.mrb[89].mxu0 }
 0x199   : > { %v1089_v12 = vadd.f32 %v3348_v52, %v1088_v11  ;;  %v2878_v13 = vpop.f32.mrb[90].mxu0  ;;  %3015 = vmatprep.mubr.bf16.mxu1 %v1417_v8 }
 0x19a   : > { %v1100_v14 = vadd.f32 %v2878_v13, %v3348_v52  ;;  %v1091_v15 = vpop.f32.mrb[91].mxu0  ;;  %3016 = vmatmul.mubr.bf16.gmra.mrb[84].mxu1 %v1418_v7  ;;  %v1337_v17 = vmax.f32 %v1097_v10, 0.0 }
 0x19b   : > { %v1092_v16 = vadd.f32 %v3348_v52, %v1091_v15  ;;  %v1335_v19 = vmax.f32 %v1089_v12, 0.0 }
 0x19c   : > { %v1338_v18 = vmax.f32 %v1100_v14, 0.0 }
 0x19d   : > { %v1336_v20 = vmax.f32 %v1092_v16, 0.0 }
 0x19e   : > { %v1420_v21 = vpack.c.bf16 %v1338_v18, %v1337_v17 }
 0x19f   : > { %v1419_v22 = vpack.c.bf16 %v1336_v20, %v1335_v19  ;;  %v2881_v23 = vpop.f32.mrb[92].mxu0 }
 0x1a0   : > { %v1113_v24 = vadd.f32 %v2881_v23, %v3348_v52  ;;  %v1104_v25 = vpop.f32.mrb[93].mxu0  ;;  %v3492_v23 = vld [vmem:[%s3783_s4] ss:$0 sm:$0xff] }
 0x1a1   : > { %v1105_v26 = vadd.f32 %v3348_v52, %v1104_v25  ;;  %v2882_v27 = vpop.f32.mrb[94].mxu0  ;;  %3019 = vmatprep.mubr.bf16.mxu1 %v1419_v22 }
 0x1a2   : > { %v1116_v28 = vadd.f32 %v2882_v27, %v3348_v52  ;;  %v1107_v29 = vpop.f32.mrb[95].mxu0  ;;  %3020 = vmatmul.mubr.bf16.gmra.mrb[88].mxu1 %v1420_v21  ;;  %v1341_v31 = vmax.f32 %v1113_v24, 0.0 }
 0x1a3   : > { %v1108_v30 = vadd.f32 %v3348_v52, %v1107_v29  ;;  %v1339_v33 = vmax.f32 %v1105_v26, 0.0 }
 0x1a4   : > { %v1342_v32 = vmax.f32 %v1116_v28, 0.0 }
 0x1a5   : > { %v1340_v34 = vmax.f32 %v1108_v30, 0.0 }
 0x1a6   : > { %v1422_v35 = vpack.c.bf16 %v1342_v32, %v1341_v31 }
 0x1a7   : > { %v1421_v36 = vpack.c.bf16 %v1340_v34, %v1339_v33  ;;  %v2885_v37 = vpop.f32.mrb[96].mxu0 }
 0x1a8   : > { %v1129_v38 = vadd.f32 %v2885_v37, %v3348_v52  ;;  %v1120_v39 = vpop.f32.mrb[97].mxu0 }
 0x1a9   : > { %v1121_v40 = vadd.f32 %v3348_v52, %v1120_v39  ;;  %v2886_v41 = vpop.f32.mrb[98].mxu0  ;;  %3023 = vmatprep.mubr.bf16.mxu1 %v1421_v36 }
 0x1aa   : > { %v1132_v42 = vadd.f32 %v2886_v41, %v3348_v52  ;;  %v1123_v43 = vpop.f32.mrb[99].mxu0  ;;  %3024 = vmatmul.mubr.bf16.gmra.mrb[92].mxu1 %v1422_v35  ;;  %v1345_v45 = vmax.f32 %v1129_v38, 0.0 }
 0x1ab   : > { %v1124_v44 = vadd.f32 %v3348_v52, %v1123_v43  ;;  %v1343_v47 = vmax.f32 %v1121_v40, 0.0 }
 0x1ac   : > { %v1346_v46 = vmax.f32 %v1132_v42, 0.0 }
 0x1ad   : > { %v1344_v48 = vmax.f32 %v1124_v44, 0.0 }
 0x1ae   : > { %v1424_v49 = vpack.c.bf16 %v1346_v46, %v1345_v45 }
 0x1af   : > { %v1423_v50 = vpack.c.bf16 %v1344_v48, %v1343_v47  ;;  %v2889_v51 = vpop.f32.mrb[100].mxu0 }
 0x1b0   : > { %v1145_v53 = vadd.f32 %v2889_v51, %v3348_v52  ;;  %v1136_v54 = vpop.f32.mrb[101].mxu0 }
 0x1b1   : > { %v1137_v55 = vadd.f32 %v3348_v52, %v1136_v54  ;;  %v2890_v56 = vpop.f32.mrb[102].mxu0  ;;  %3027 = vmatprep.mubr.bf16.mxu1 %v1423_v50 }
 0x1b2   : > { %v1148_v57 = vadd.f32 %v2890_v56, %v3348_v52  ;;  %v1139_v58 = vpop.f32.mrb[103].mxu0  ;;  %3028 = vmatmul.mubr.bf16.gmra.mrb[96].mxu1 %v1424_v49  ;;  %v1349_v60 = vmax.f32 %v1145_v53, 0.0 }
 0x1b3   : > { %v1140_v59 = vadd.f32 %v3348_v52, %v1139_v58  ;;  %v1347_v62 = vmax.f32 %v1137_v55, 0.0 }
 0x1b4   : > { %v1350_v61 = vmax.f32 %v1148_v57, 0.0 }
 0x1b5   : > { %v1348_v63 = vmax.f32 %v1140_v59, 0.0 }
 0x1b6   : > { %v1426_v0 = vpack.c.bf16 %v1350_v61, %v1349_v60 }
 0x1b7   : > { %v1425_v1 = vpack.c.bf16 %v1348_v63, %v1347_v62  ;;  %v2893_v2 = vpop.f32.mrb[104].mxu0 }
 0x1b8   : > { %v1161_v3 = vadd.f32 %v2893_v2, %v3348_v52  ;;  %v1152_v4 = vpop.f32.mrb[105].mxu0 }
 0x1b9   : > { %v1153_v5 = vadd.f32 %v3348_v52, %v1152_v4  ;;  %v2894_v6 = vpop.f32.mrb[106].mxu0  ;;  %3031 = vmatprep.mubr.bf16.mxu1 %v1425_v1 }
 0x1ba   : > { %v1164_v7 = vadd.f32 %v2894_v6, %v3348_v52  ;;  %v1155_v8 = vpop.f32.mrb[107].mxu0  ;;  %3032 = vmatmul.mubr.bf16.gmra.mrb[100].mxu1 %v1426_v0  ;;  %v1353_v10 = vmax.f32 %v1161_v3, 0.0  ;;  %v3513_v3 = vld [vmem:[%s3781_s2] ss:$0 sm:$0xff] }
 0x1bb   : > { %v1156_v9 = vadd.f32 %v3348_v52, %v1155_v8  ;;  %v1351_v12 = vmax.f32 %v1153_v5, 0.0 }
 0x1bc   : > { %v1354_v11 = vmax.f32 %v1164_v7, 0.0 }
 0x1bd   : > { %v1352_v13 = vmax.f32 %v1156_v9, 0.0 }
 0x1be   : > { %v1428_v14 = vpack.c.bf16 %v1354_v11, %v1353_v10 }
 0x1bf   : > { %v1427_v15 = vpack.c.bf16 %v1352_v13, %v1351_v12  ;;  %v2897_v16 = vpop.f32.mrb[108].mxu0 }
 0x1c0   : > { %v1177_v17 = vadd.f32 %v2897_v16, %v3348_v52  ;;  %v1168_v18 = vpop.f32.mrb[109].mxu0 }
 0x1c1   : > { %v1169_v19 = vadd.f32 %v3348_v52, %v1168_v18  ;;  %v2898_v20 = vpop.f32.mrb[110].mxu0  ;;  %3035 = vmatprep.mubr.bf16.mxu1 %v1427_v15 }
 0x1c2   : > { %v1180_v21 = vadd.f32 %v2898_v20, %v3348_v52  ;;  %v1171_v22 = vpop.f32.mrb[111].mxu0  ;;  %3036 = vmatmul.mubr.bf16.gmra.mrb[104].mxu1 %v1428_v14  ;;  %v1357_v25 = vmax.f32 %v1177_v17, 0.0 }
 0x1c3   : > { %v1172_v24 = vadd.f32 %v3348_v52, %v1171_v22  ;;  %v1355_v28 = vmax.f32 %v1169_v19, 0.0 }
 0x1c4   : > { %v1358_v26 = vmax.f32 %v1180_v21, 0.0 }
 0x1c5   : > { %v2933_v27 = vpop.f32.mrb[0].mxu1  ;;  %v1356_v29 = vmax.f32 %v1172_v24, 0.0 }
 0x1c6   : > { %v1553_v30 = vadd.f32 %v2933_v27, %v3492_v23  ;;  %v1544_v31 = vpop.f32.mrb[1].mxu1  ;;  %v1430_v32 = vpack.c.bf16 %v1358_v26, %v1357_v25 }
 0x1c7   : > { %v1545_v33 = vadd.f32 %v3492_v23, %v1544_v31  ;;  %v2934_v34 = vpop.f32.mrb[2].mxu1  ;;  %v1429_v35 = vpack.c.bf16 %v1356_v29, %v1355_v28  ;;  %v2901_v36 = vpop.f32.mrb[112].mxu0 }
 0x1c8   : > { %v1556_v37 = vadd.f32 %v2934_v34, %v3492_v23  ;;  %v1547_v38 = vpop.f32.mrb[3].mxu1  ;;  %v1193_v39 = vadd.f32 %v2901_v36, %v3348_v52  ;;  %v1184_v40 = vpop.f32.mrb[113].mxu0  ;;  %v2057_v44 = vmax.f32 %v1553_v30, 0.0 }
 0x1c9   : > { %v1548_v41 = vadd.f32 %v3492_v23, %v1547_v38  ;;  %v1185_v42 = vadd.f32 %v3348_v52, %v1184_v40  ;;  %v2902_v43 = vpop.f32.mrb[114].mxu0  ;;  %3039 = vmatprep.mubr.bf16.mxu1 %v1429_v35  ;;  %v2055_v48 = vmax.f32 %v1545_v33, 0.0 }
 0x1ca   : > { %v2058_v45 = vmax.f32 %v1556_v37, 0.0  ;;  %v1196_v46 = vadd.f32 %v2902_v43, %v3348_v52  ;;  %v1187_v47 = vpop.f32.mrb[115].mxu0  ;;  %3040 = vmatmul.mubr.bf16.gmra.mrb[108].mxu1 %v1430_v32  ;;  %v1361_v53 = vmax.f32 %v1193_v39, 0.0 }
 0x1cb   : > { %v2056_v49 = vmax.f32 %v1548_v41, 0.0  ;;  %v1188_v50 = vadd.f32 %v3348_v52, %v1187_v47  ;;  %v1359_v57 = vmax.f32 %v1185_v42, 0.0 }
 0x1cc   : > { %v3503_v51 = vpack.c.bf16 %v2058_v45, %v2057_v44  ;;  %v1362_v54 = vmax.f32 %v1196_v46, 0.0 }
 0x1cd   : > { %v3505_v55 = vpack.c.bf16 %v2056_v49, %v2055_v48  ;;  %v2937_v56 = vpop.f32.mrb[4].mxu1  ;;  %v1360_v58 = vmax.f32 %v1188_v50, 0.0 }
 0x1ce   : > { %v1569_v59 = vadd.f32 %v2937_v56, %v3492_v23  ;;  %v1560_v60 = vpop.f32.mrb[5].mxu1  ;;  %v1432_v61 = vpack.c.bf16 %v1362_v54, %v1361_v53 }
 0x1cf   : > { %v1561_v62 = vadd.f32 %v3492_v23, %v1560_v60  ;;  %v2938_v63 = vpop.f32.mrb[6].mxu1  ;;  %v1431_v0 = vpack.c.bf16 %v1360_v58, %v1359_v57  ;;  %v2905_v1 = vpop.f32.mrb[116].mxu0 }
 0x1d0   : > { %v1572_v52 = vadd.f32 %v2938_v63, %v3492_v23  ;;  %v1563_v2 = vpop.f32.mrb[7].mxu1  ;;  %v1209_v4 = vadd.f32 %v3513_v3, %v2905_v1  ;;  %v1200_v5 = vpop.f32.mrb[117].mxu0  ;;  %v2061_v9 = vmax.f32 %v1569_v59, 0.0 }
 0x1d1   : > { %v1564_v6 = vadd.f32 %v3492_v23, %v1563_v2  ;;  %3043 = vmatprep.mubr.bf16.mxu1 %v1431_v0  ;;  %v1201_v7 = vadd.f32 %v3513_v3, %v1200_v5  ;;  %v2906_v8 = vpop.f32.mrb[118].mxu0  ;;  %v2059_v14 = vmax.f32 %v1561_v62, 0.0 }
 0x1d2   : > { %v2062_v10 = vmax.f32 %v1572_v52, 0.0  ;;  %3044 = vmatmul.mubr.bf16.gmra.mrb[112].mxu1 %v1432_v61  ;;  %v1365_v11 = vmax.f32 %v1209_v4, 0.0  ;;  %v1212_v12 = vadd.f32 %v3513_v3, %v2906_v8  ;;  %v1203_v13 = vpop.f32.mrb[119].mxu0 }
 0x1d3   : > { %v2060_v15 = vmax.f32 %v1564_v6, 0.0  ;;  %v1363_v16 = vmax.f32 %v1201_v7, 0.0  ;;  %v1204_v17 = vadd.f32 %v3513_v3, %v1203_v13 }
 0x1d4   : > { %v3520_v18 = vpack.c.bf16 %v2062_v10, %v2061_v9  ;;  %v1366_v19 = vmax.f32 %v1212_v12, 0.0 }
 0x1d5   : > { %v3522_v20 = vpack.c.bf16 %v2060_v15, %v2059_v14  ;;  %v2941_v21 = vpop.f32.mrb[8].mxu1  ;;  %v1364_v22 = vmax.f32 %v1204_v17, 0.0 }
 0x1d6   : > { %v1585_v24 = vadd.f32 %v2941_v21, %v3492_v23  ;;  %v1576_v25 = vpop.f32.mrb[9].mxu1  ;;  %v1434_v26 = vpack.c.bf16 %v1366_v19, %v1365_v11 }
 0x1d7   : > { %v1577_v27 = vadd.f32 %v3492_v23, %v1576_v25  ;;  %v2942_v28 = vpop.f32.mrb[10].mxu1  ;;  %v1433_v29 = vpack.c.bf16 %v1364_v22, %v1363_v16  ;;  %v2909_v30 = vpop.f32.mrb[120].mxu0 }
 0x1d8   : > { %v1588_v31 = vadd.f32 %v2942_v28, %v3492_v23  ;;  %v1579_v32 = vpop.f32.mrb[11].mxu1  ;;  %v1225_v33 = vadd.f32 %v3513_v3, %v2909_v30  ;;  %v1216_v34 = vpop.f32.mrb[121].mxu0  ;;  %v2065_v38 = vmax.f32 %v1585_v24, 0.0 }
 0x1d9   : > { %v1580_v35 = vadd.f32 %v3492_v23, %v1579_v32  ;;  %3047 = vmatprep.mubr.bf16.mxu1 %v1433_v29  ;;  %v1217_v36 = vadd.f32 %v3513_v3, %v1216_v34  ;;  %v2910_v37 = vpop.f32.mrb[122].mxu0  ;;  %v2063_v43 = vmax.f32 %v1577_v27, 0.0 }
 0x1da   : > { %v2066_v39 = vmax.f32 %v1588_v31, 0.0  ;;  %3048 = vmatmul.mubr.bf16.gmra.mrb[116].mxu1 %v1434_v26  ;;  %v1369_v40 = vmax.f32 %v1225_v33, 0.0  ;;  %v1228_v41 = vadd.f32 %v3513_v3, %v2910_v37  ;;  %v1219_v42 = vpop.f32.mrb[123].mxu0  ;;  %v3555_v37 = vld [vmem:[%s3784_s5] sm:$0xf] }
 0x1db   : > { %v2064_v44 = vmax.f32 %v1580_v35, 0.0  ;;  %v1367_v45 = vmax.f32 %v1217_v36, 0.0  ;;  %v1220_v46 = vadd.f32 %v3513_v3, %v1219_v42  ;;  %2725 = vmatprep.mubr.bf16.mxu0 %v3555_v37 }
 0x1dc   : > { %v3532_v47 = vpack.c.bf16 %v2066_v39, %v2065_v38  ;;  %v1370_v48 = vmax.f32 %v1228_v41, 0.0 }
 0x1dd   : > { %v3534_v49 = vpack.c.bf16 %v2064_v44, %v2063_v43  ;;  %v2945_v50 = vpop.f32.mrb[12].mxu1  ;;  %v1368_v53 = vmax.f32 %v1220_v46, 0.0 }
 0x1de   : > { %v1601_v54 = vadd.f32 %v2945_v50, %v3492_v23  ;;  %v1592_v56 = vpop.f32.mrb[13].mxu1  ;;  %v1436_v57 = vpack.c.bf16 %v1370_v48, %v1369_v40 }
 0x1df   : > { %v1593_v58 = vadd.f32 %v3492_v23, %v1592_v56  ;;  %v2946_v59 = vpop.f32.mrb[14].mxu1  ;;  %v1435_v60 = vpack.c.bf16 %v1368_v53, %v1367_v45  ;;  %v2913_v61 = vpop.f32.mrb[124].mxu0 }
 0x1e0   : > { %v1604_v62 = vadd.f32 %v2946_v59, %v3492_v23  ;;  %v1595_v63 = vpop.f32.mrb[15].mxu1  ;;  %v1241_v0 = vadd.f32 %v3513_v3, %v2913_v61  ;;  %v1232_v1 = vpop.f32.mrb[125].mxu0  ;;  %v2069_v5 = vmax.f32 %v1601_v54, 0.0 }
 0x1e1   : > { %v1596_v52 = vadd.f32 %v3492_v23, %v1595_v63  ;;  %3051 = vmatprep.mubr.bf16.mxu1 %v1435_v60  ;;  %v1233_v2 = vadd.f32 %v3513_v3, %v1232_v1  ;;  %v2914_v4 = vpop.f32.mrb[126].mxu0  ;;  %v2067_v10 = vmax.f32 %v1593_v58, 0.0 }
 0x1e2   : > { %v2070_v6 = vmax.f32 %v1604_v62, 0.0  ;;  %3052 = vmatmul.mubr.bf16.gmra.mrb[120].mxu1 %v1436_v57  ;;  %v1373_v7 = vmax.f32 %v1241_v0, 0.0  ;;  %v1244_v8 = vadd.f32 %v3513_v3, %v2914_v4  ;;  %v1235_v9 = vpop.f32.mrb[127].mxu0 }
 0x1e3   : > { %v2068_v11 = vmax.f32 %v1596_v52, 0.0  ;;  %v1371_v12 = vmax.f32 %v1233_v2, 0.0  ;;  %v1236_v13 = vadd.f32 %v3513_v3, %v1235_v9 }
 0x1e4   : > { %v3544_v14 = vpack.c.bf16 %v2070_v6, %v2069_v5  ;;  %v1374_v15 = vmax.f32 %v1244_v8, 0.0 }
 0x1e5   : > { %v3546_v16 = vpack.c.bf16 %v2068_v11, %v2067_v10  ;;  %v2949_v17 = vpop.f32.mrb[16].mxu1  ;;  %v1372_v19 = vmax.f32 %v1236_v13, 0.0 }
 0x1e6   : > { %v1617_v21 = vadd.f32 %v2949_v17, %v3492_v23  ;;  %v1608_v22 = vpop.f32.mrb[17].mxu1  ;;  %v1438_v24 = vpack.c.bf16 %v1374_v15, %v1373_v7 }
 0x1e7   : > { %v1609_v25 = vadd.f32 %v3492_v23, %v1608_v22  ;;  %v2950_v26 = vpop.f32.mrb[18].mxu1  ;;  %v1437_v27 = vpack.c.bf16 %v1372_v19, %v1371_v12 }
 0x1e8   : > { %v1620_v28 = vadd.f32 %v2950_v26, %v3492_v23  ;;  %v1611_v29 = vpop.f32.mrb[19].mxu1  ;;  %v2073_v30 = vmax.f32 %v1617_v21, 0.0 }
 0x1e9   : > { %v1612_v3 = vadd.f32 %v3492_v23, %v1611_v29  ;;  %3055 = vmatprep.mubr.bf16.mxu1 %v1437_v27  ;;  %v2071_v32 = vmax.f32 %v1609_v25, 0.0 }
 0x1ea   : > { %v2074_v31 = vmax.f32 %v1620_v28, 0.0  ;;  %3056 = vmatmul.mubr.bf16.gmra.mrb[124].mxu1 %v1438_v24 }
 0x1eb   : > { %v2072_v33 = vmax.f32 %v1612_v3, 0.0  ;;  %2743 = vmatprep.mubr.bf16.mxu1 %v3555_v37 }
 0x1ec   : > { %v2192_v34 = vpack.c.bf16 %v2074_v31, %v2073_v30 }
 0x1ed   : > { %v2191_v35 = vpack.c.bf16 %v2072_v33, %v2071_v32  ;;  %v2953_v36 = vpop.f32.mrb[20].mxu1 }
 0x1ee   : > { %v1633_v38 = vadd.f32 %v2953_v36, %v3492_v23  ;;  %v1624_v39 = vpop.f32.mrb[21].mxu1 }
 0x1ef   : > { %v1625_v40 = vadd.f32 %v3492_v23, %v1624_v39  ;;  %v2954_v41 = vpop.f32.mrb[22].mxu1  ;;  %2709 = vmatprep.subr.bf16.mxu0 %v2191_v35 }
 0x1f0   : > { %v1636_v42 = vadd.f32 %v2954_v41, %v3492_v23  ;;  %v1627_v43 = vpop.f32.mrb[23].mxu1  ;;  %2710 = vmatpush3.bf16.xpose.msra.mxu0 %v3505_v55  ;;  %v2077_v45 = vmax.f32 %v1633_v38, 0.0 }
 0x1f1   : > { %v1628_v44 = vadd.f32 %v3492_v23, %v1627_v43  ;;  %2711 = vmatprep.subr.bf16.mxu0 %v2192_v34  ;;  %v2075_v48 = vmax.f32 %v1625_v40, 0.0 }
 0x1f2   : > { %v2078_v46 = vmax.f32 %v1636_v42, 0.0 }
 0x1f3   : > { %v2076_v50 = vmax.f32 %v1628_v44, 0.0 }
 0x1f4   : > { %v2194_v53 = vpack.c.bf16 %v2078_v46, %v2077_v45 }
 0x1f5   : > { %v2193_v54 = vpack.c.bf16 %v2076_v50, %v2075_v48  ;;  %v2957_v56 = vpop.f32.mrb[24].mxu1 }
 0x1f6   : > { %v1649_v57 = vadd.f32 %v2957_v56, %v3492_v23  ;;  %v1640_v58 = vpop.f32.mrb[25].mxu1 }
 0x1f7   : > { %v1641_v59 = vadd.f32 %v3492_v23, %v1640_v58  ;;  %v2958_v60 = vpop.f32.mrb[26].mxu1 }
 0x1f8   : > { %v1652_v61 = vadd.f32 %v2958_v60, %v3492_v23  ;;  %v1643_v62 = vpop.f32.mrb[27].mxu1  ;;  %2712 = vmatpush3.bf16.xpose.msra.mxu0 %v3503_v51  ;;  %v2081_v63 = vmax.f32 %v1649_v57, 0.0 }
 0x1f9   : > { %v1644_v55 = vadd.f32 %v3492_v23, %v1643_v62  ;;  %2713 = vmatprep.subr.bf16.mxu0 %v2193_v54  ;;  %v2079_v1 = vmax.f32 %v1641_v59, 0.0 }
 0x1fa   : > { %v2082_v0 = vmax.f32 %v1652_v61, 0.0 }
 0x1fb   : > { %v2080_v52 = vmax.f32 %v1644_v55, 0.0 }
 0x1fc   : > { %v2196_v2 = vpack.c.bf16 %v2082_v0, %v2081_v63 }
 0x1fd   : > { %v2195_v4 = vpack.c.bf16 %v2080_v52, %v2079_v1  ;;  %v2961_v5 = vpop.f32.mrb[28].mxu1 }
 0x1fe   : > { %v1665_v6 = vadd.f32 %v2961_v5, %v3492_v23  ;;  %v1656_v7 = vpop.f32.mrb[29].mxu1 }
 0x1ff   : > { %v1657_v8 = vadd.f32 %v3492_v23, %v1656_v7  ;;  %v2962_v9 = vpop.f32.mrb[30].mxu1 }
 0x200   : > { %v1668_v10 = vadd.f32 %v2962_v9, %v3492_v23  ;;  %v1659_v11 = vpop.f32.mrb[31].mxu1  ;;  %2714 = vmatpush3.bf16.xpose.msra.mxu0 %v3522_v20  ;;  %v2085_v12 = vmax.f32 %v1665_v6, 0.0 }
 0x201   : > { %v1660_v51 = vadd.f32 %v3492_v23, %v1659_v11  ;;  %2715 = vmatprep.subr.bf16.mxu0 %v2194_v53  ;;  %v2083_v15 = vmax.f32 %v1657_v8, 0.0 }
 0x202   : > { %v2086_v13 = vmax.f32 %v1668_v10, 0.0 }
 0x203   : > { %v2084_v17 = vmax.f32 %v1660_v51, 0.0 }
 0x204   : > { %v2198_v19 = vpack.c.bf16 %v2086_v13, %v2085_v12 }
 0x205   : > { %v2197_v21 = vpack.c.bf16 %v2084_v17, %v2083_v15  ;;  %v2965_v22 = vpop.f32.mrb[32].mxu1 }
 0x206   : > { %v1681_v24 = vadd.f32 %v2965_v22, %v3492_v23  ;;  %v1672_v25 = vpop.f32.mrb[33].mxu1 }
 0x207   : > { %v1673_v26 = vadd.f32 %v3492_v23, %v1672_v25  ;;  %v2966_v27 = vpop.f32.mrb[34].mxu1 }
 0x208   : > { %v1684_v28 = vadd.f32 %v2966_v27, %v3492_v23  ;;  %v1675_v29 = vpop.f32.mrb[35].mxu1  ;;  %2716 = vmatpush3.bf16.xpose.msra.mxu0 %v3520_v18  ;;  %v2089_v3 = vmax.f32 %v1681_v24, 0.0 }
 0x209   : > { %v1676_v20 = vadd.f32 %v3492_v23, %v1675_v29  ;;  %2717 = vmatprep.subr.bf16.mxu0 %v2195_v4  ;;  %v2087_v31 = vmax.f32 %v1673_v26, 0.0 }
 0x20a   : > { %v2090_v30 = vmax.f32 %v1684_v28, 0.0 }
 0x20b   : > { %v2088_v32 = vmax.f32 %v1676_v20, 0.0 }
 0x20c   : > { %v3579_v33 = vpack.c.bf16 %v2090_v30, %v2089_v3 }
 0x20d   : > { %v3581_v34 = vpack.c.bf16 %v2088_v32, %v2087_v31  ;;  %v2969_v35 = vpop.f32.mrb[36].mxu1 }
 0x20e   : > { %v1697_v36 = vadd.f32 %v2969_v35, %v3492_v23  ;;  %v1688_v38 = vpop.f32.mrb[37].mxu1 }
 0x20f   : > { %v1689_v39 = vadd.f32 %v3492_v23, %v1688_v38  ;;  %v2970_v40 = vpop.f32.mrb[38].mxu1 }
 0x210   : > { %v1700_v18 = vadd.f32 %v2970_v40, %v3492_v23  ;;  %v1691_v41 = vpop.f32.mrb[39].mxu1  ;;  %2718 = vmatpush3.bf16.xpose.msra.mxu0 %v3534_v49  ;;  %v2093_v43 = vmax.f32 %v1697_v36, 0.0 }
 0x211   : > { %v1692_v42 = vadd.f32 %v3492_v23, %v1691_v41  ;;  %2719 = vmatprep.subr.bf16.mxu0 %v2196_v2  ;;  %v2091_v45 = vmax.f32 %v1689_v39, 0.0 }
 0x212   : > { %v2094_v44 = vmax.f32 %v1700_v18, 0.0 }
 0x213   : > { %v2092_v46 = vmax.f32 %v1692_v42, 0.0 }
 0x214   : > { %v3588_v48 = vpack.c.bf16 %v2094_v44, %v2093_v43 }
 0x215   : > { %v3590_v50 = vpack.c.bf16 %v2092_v46, %v2091_v45  ;;  %v2973_v53 = vpop.f32.mrb[40].mxu1 }
 0x216   : > { %v1713_v54 = vadd.f32 %v2973_v53, %v3492_v23  ;;  %v1704_v56 = vpop.f32.mrb[41].mxu1 }
 0x217   : > { %v1705_v57 = vadd.f32 %v3492_v23, %v1704_v56  ;;  %v2974_v58 = vpop.f32.mrb[42].mxu1 }
 0x218   : > { %v1716_v49 = vadd.f32 %v2974_v58, %v3492_v23  ;;  %v1707_v59 = vpop.f32.mrb[43].mxu1  ;;  %2720 = vmatpush3.bf16.xpose.msra.mxu0 %v3532_v47  ;;  %v2097_v61 = vmax.f32 %v1713_v54, 0.0 }
 0x219   : > { %v1708_v60 = vadd.f32 %v3492_v23, %v1707_v59  ;;  %2721 = vmatprep.subr.bf16.mxu0 %v2197_v21  ;;  %v2095_v55 = vmax.f32 %v1705_v57, 0.0 }
 0x21a   : > { %v2098_v62 = vmax.f32 %v1716_v49, 0.0 }
 0x21b   : > { %v2096_v63 = vmax.f32 %v1708_v60, 0.0 }
 0x21c   : > { %v3597_v0 = vpack.c.bf16 %v2098_v62, %v2097_v61 }
 0x21d   : > { %v3599_v1 = vpack.c.bf16 %v2096_v63, %v2095_v55  ;;  %v2977_v52 = vpop.f32.mrb[44].mxu1 }
 0x21e   : > { %v1729_v2 = vadd.f32 %v2977_v52, %v3492_v23  ;;  %v1720_v4 = vpop.f32.mrb[45].mxu1 }
 0x21f   : > { %v1721_v5 = vadd.f32 %v3492_v23, %v1720_v4  ;;  %v2978_v6 = vpop.f32.mrb[46].mxu1 }
 0x220   : > { %v1732_v47 = vadd.f32 %v2978_v6, %v3492_v23  ;;  %v1723_v7 = vpop.f32.mrb[47].mxu1  ;;  %2722 = vmatpush3.bf16.xpose.msra.mxu0 %v3546_v16  ;;  %v2101_v9 = vmax.f32 %v1729_v2, 0.0 }
 0x221   : > { %v1724_v8 = vadd.f32 %v3492_v23, %v1723_v7  ;;  %2723 = vmatprep.subr.bf16.mxu0 %v2198_v19  ;;  %v2099_v11 = vmax.f32 %v1721_v5, 0.0 }
 0x222   : > { %v2102_v10 = vmax.f32 %v1732_v47, 0.0 }
 0x223   : > { %v2100_v51 = vmax.f32 %v1724_v8, 0.0 }
 0x224   : > { %v3606_v12 = vpack.c.bf16 %v2102_v10, %v2101_v9 }
 0x225   : > { %v3608_v13 = vpack.c.bf16 %v2100_v51, %v2099_v11  ;;  %v2981_v15 = vpop.f32.mrb[48].mxu1 }
 0x226   : > { %v1745_v17 = vadd.f32 %v2981_v15, %v3492_v23  ;;  %v1736_v21 = vpop.f32.mrb[49].mxu1 }
 0x227   : > { %v1737_v22 = vadd.f32 %v3492_v23, %v1736_v21  ;;  %v2982_v24 = vpop.f32.mrb[50].mxu1 }
 0x228   : > { %v1748_v16 = vadd.f32 %v2982_v24, %v3492_v23  ;;  %v1739_v25 = vpop.f32.mrb[51].mxu1  ;;  %2724 = vmatpush3.bf16.xpose.msra.mxu0 %v3544_v14  ;;  %v2105_v26 = vmax.f32 %v1745_v17, 0.0 }
 0x229   : > { %v1740_v19 = vadd.f32 %v3492_v23, %v1739_v25  ;;  %v2103_v28 = vmax.f32 %v1737_v22, 0.0 }
 0x22a   : > { %v2106_v27 = vmax.f32 %v1748_v16, 0.0 }
 0x22b   : > { %v2104_v29 = vmax.f32 %v1740_v19, 0.0 }
 0x22c   : > { %v2208_v20 = vpack.c.bf16 %v2106_v27, %v2105_v26 }
 0x22d   : > { %v2207_v3 = vpack.c.bf16 %v2104_v29, %v2103_v28  ;;  %v2985_v30 = vpop.f32.mrb[52].mxu1 }
 0x22e   : > { %v1761_v31 = vadd.f32 %v2985_v30, %v3492_v23  ;;  %v1752_v32 = vpop.f32.mrb[53].mxu1 }
 0x22f   : > { %2727 = vmatprep.subr.bf16.mxu1 %v2207_v3  ;;  %v1753_v35 = vadd.f32 %v3492_v23, %v1752_v32  ;;  %v2986_v36 = vpop.f32.mrb[54].mxu1  ;;  %2726 = vmatmul.mubr.bf16.vlgmr.msra.gmra.mrb[128].mxu0 %v3555_v37 }
 0x230   : > { %2728 = vmatpush3.bf16.xpose.msra.mxu1 %v3581_v34  ;;  %v1764_v14 = vadd.f32 %v2986_v36, %v3492_v23  ;;  %v1755_v38 = vpop.f32.mrb[55].mxu1  ;;  %2761 = vmatprep.mubr.bf16.mxu0 %v3555_v37  ;;  %v2109_v40 = vmax.f32 %v1761_v31, 0.0 }
 0x231   : > { %2729 = vmatprep.subr.bf16.mxu1 %v2208_v20  ;;  %v1756_v39 = vadd.f32 %v3492_v23, %v1755_v38  ;;  %v2107_v41 = vmax.f32 %v1753_v35, 0.0 }
 0x232   : > { %v2110_v18 = vmax.f32 %v1764_v14, 0.0 }
 0x233   : > { %v2108_v42 = vmax.f32 %v1756_v39, 0.0 }
 0x234   : > { %v2210_v43 = vpack.c.bf16 %v2110_v18, %v2109_v40 }
 0x235   : > { %v2209_v44 = vpack.c.bf16 %v2108_v42, %v2107_v41  ;;  %v2989_v45 = vpop.f32.mrb[56].mxu1 }
 0x236   : > { %v1777_v46 = vadd.f32 %v2989_v45, %v3492_v23  ;;  %v1768_v53 = vpop.f32.mrb[57].mxu1 }
 0x237   : > { %v1769_v34 = vadd.f32 %v3492_v23, %v1768_v53  ;;  %v2990_v54 = vpop.f32.mrb[58].mxu1 }
 0x238   : > { %2730 = vmatpush3.bf16.xpose.msra.mxu1 %v3579_v33  ;;  %v1780_v56 = vadd.f32 %v2990_v54, %v3492_v23  ;;  %v1771_v57 = vpop.f32.mrb[59].mxu1  ;;  %v2113_v49 = vmax.f32 %v1777_v46, 0.0 }
 0x239   : > { %2731 = vmatprep.subr.bf16.mxu1 %v2209_v44  ;;  %v1772_v58 = vadd.f32 %v3492_v23, %v1771_v57  ;;  %v2111_v60 = vmax.f32 %v1769_v34, 0.0 }
 0x23a   : > { %v2114_v59 = vmax.f32 %v1780_v56, 0.0 }
 0x23b   : > { %v2112_v61 = vmax.f32 %v1772_v58, 0.0 }
 0x23c   : > { %v2212_v62 = vpack.c.bf16 %v2114_v59, %v2113_v49 }
 0x23d   : > { %v2211_v55 = vpack.c.bf16 %v2112_v61, %v2111_v60  ;;  %v2993_v63 = vpop.f32.mrb[60].mxu1 }
 0x23e   : > { %v1793_v52 = vadd.f32 %v2993_v63, %v3492_v23  ;;  %v1784_v2 = vpop.f32.mrb[61].mxu1 }
 0x23f   : > { %v1785_v4 = vadd.f32 %v3492_v23, %v1784_v2  ;;  %v2994_v5 = vpop.f32.mrb[62].mxu1 }
 0x240   : > { %2732 = vmatpush3.bf16.xpose.msra.mxu1 %v3590_v50  ;;  %v1796_v33 = vadd.f32 %v2994_v5, %v3492_v23  ;;  %v1787_v6 = vpop.f32.mrb[63].mxu1  ;;  %v2117_v7 = vmax.f32 %v1793_v52, 0.0 }
 0x241   : > { %2733 = vmatprep.subr.bf16.mxu1 %v2210_v43  ;;  %v1788_v47 = vadd.f32 %v3492_v23, %v1787_v6  ;;  %v2115_v9 = vmax.f32 %v1785_v4, 0.0 }
 0x242   : > { %v2118_v8 = vmax.f32 %v1796_v33, 0.0 }
 0x243   : > { %v2116_v10 = vmax.f32 %v1788_v47, 0.0 }
 0x244   : > { %v2214_v11 = vpack.c.bf16 %v2118_v8, %v2117_v7 }
 0x245   : > { %v2213_v51 = vpack.c.bf16 %v2116_v10, %v2115_v9  ;;  %v2997_v15 = vpop.f32.mrb[64].mxu1 }
 0x246   : > { %v1809_v17 = vadd.f32 %v2997_v15, %v3492_v23  ;;  %v1800_v21 = vpop.f32.mrb[65].mxu1 }
 0x247   : > { %v1801_v22 = vadd.f32 %v3492_v23, %v1800_v21  ;;  %v2998_v24 = vpop.f32.mrb[66].mxu1 }
 0x248   : > { %2734 = vmatpush3.bf16.xpose.msra.mxu1 %v3588_v48  ;;  %v1812_v50 = vadd.f32 %v2998_v24, %v3492_v23  ;;  %v1803_v16 = vpop.f32.mrb[67].mxu1  ;;  %v2121_v19 = vmax.f32 %v1809_v17, 0.0 }
 0x249   : > { %2735 = vmatprep.subr.bf16.mxu1 %v2211_v55  ;;  %v1804_v25 = vadd.f32 %v3492_v23, %v1803_v16  ;;  %v2119_v27 = vmax.f32 %v1801_v22, 0.0 }
 0x24a   : > { %v2122_v26 = vmax.f32 %v1812_v50, 0.0 }
 0x24b   : > { %v2120_v28 = vmax.f32 %v1804_v25, 0.0 }
 0x24c   : > { %v3637_v29 = vpack.c.bf16 %v2122_v26, %v2121_v19 }
 0x24d   : > { %v3639_v20 = vpack.c.bf16 %v2120_v28, %v2119_v27  ;;  %v3001_v3 = vpop.f32.mrb[68].mxu1 }
 0x24e   : > { %v1825_v30 = vadd.f32 %v3001_v3, %v3492_v23  ;;  %v1816_v31 = vpop.f32.mrb[69].mxu1 }
 0x24f   : > { %v1817_v48 = vadd.f32 %v3492_v23, %v1816_v31  ;;  %v3002_v32 = vpop.f32.mrb[70].mxu1 }
 0x250   : > { %2736 = vmatpush3.bf16.xpose.msra.mxu1 %v3599_v1  ;;  %v1828_v35 = vadd.f32 %v3002_v32, %v3492_v23  ;;  %v1819_v36 = vpop.f32.mrb[71].mxu1  ;;  %v2125_v38 = vmax.f32 %v1825_v30, 0.0 }
 0x251   : > { %2737 = vmatprep.subr.bf16.mxu1 %v2212_v62  ;;  %v1820_v14 = vadd.f32 %v3492_v23, %v1819_v36  ;;  %v2123_v40 = vmax.f32 %v1817_v48, 0.0 }
 0x252   : > { %v2126_v39 = vmax.f32 %v1828_v35, 0.0  ;;  %v3092_v35 = vmov 0  }
 0x253   : > { %v2124_v18 = vmax.f32 %v1820_v14, 0.0  ;;  %3069 = vset.pattern.permute.xlu0 %v3092_v35 }
 0x254   : > { %v3646_v41 = vpack.c.bf16 %v2126_v39, %v2125_v38 }
 0x255   : > { %v3648_v42 = vpack.c.bf16 %v2124_v18, %v2123_v40  ;;  %v3005_v43 = vpop.f32.mrb[72].mxu1 }
 0x256   : > { %v1841_v44 = vadd.f32 %v3005_v43, %v3492_v23  ;;  %v1832_v45 = vpop.f32.mrb[73].mxu1 }
 0x257   : > { %v1833_v1 = vadd.f32 %v3492_v23, %v1832_v45  ;;  %v3006_v46 = vpop.f32.mrb[74].mxu1 }
 0x258   : > { %2738 = vmatpush3.bf16.xpose.msra.mxu1 %v3597_v0  ;;  %v1844_v53 = vadd.f32 %v3006_v46, %v3492_v23  ;;  %v1835_v34 = vpop.f32.mrb[75].mxu1  ;;  %v2129_v56 = vmax.f32 %v1841_v44, 0.0 }
 0x259   : > { %2739 = vmatprep.subr.bf16.mxu1 %v2213_v51  ;;  %v1836_v54 = vadd.f32 %v3492_v23, %v1835_v34  ;;  %v2127_v58 = vmax.f32 %v1833_v1, 0.0 }
 0x25a   : > { %v2130_v57 = vmax.f32 %v1844_v53, 0.0 }
 0x25b   : > { %v2128_v49 = vmax.f32 %v1836_v54, 0.0 }
 0x25c   : > { %v3655_v59 = vpack.c.bf16 %v2130_v57, %v2129_v56 }
 0x25d   : > { %v3657_v60 = vpack.c.bf16 %v2128_v49, %v2127_v58  ;;  %v3009_v61 = vpop.f32.mrb[76].mxu1 }
 0x25e   : > { %v1857_v62 = vadd.f32 %v3009_v61, %v3492_v23  ;;  %v1848_v55 = vpop.f32.mrb[77].mxu1 }
 0x25f   : > { %v1849_v0 = vadd.f32 %v3492_v23, %v1848_v55  ;;  %v3010_v63 = vpop.f32.mrb[78].mxu1 }
 0x260   : > { %2740 = vmatpush3.bf16.xpose.msra.mxu1 %v3608_v13  ;;  %v1860_v52 = vadd.f32 %v3010_v63, %v3492_v23  ;;  %v1851_v2 = vpop.f32.mrb[79].mxu1  ;;  %v2133_v5 = vmax.f32 %v1857_v62, 0.0 }
 0x261   : > { %2741 = vmatprep.subr.bf16.mxu1 %v2214_v11  ;;  %v1852_v4 = vadd.f32 %v3492_v23, %v1851_v2  ;;  %v2131_v6 = vmax.f32 %v1849_v0, 0.0 }
 0x262   : > { %v2134_v33 = vmax.f32 %v1860_v52, 0.0 }
 0x263   : > { %v2132_v47 = vmax.f32 %v1852_v4, 0.0 }
 0x264   : > { %v3664_v7 = vpack.c.bf16 %v2134_v33, %v2133_v5 }
 0x265   : > { %v3666_v8 = vpack.c.bf16 %v2132_v47, %v2131_v6  ;;  %v3013_v9 = vpop.f32.mrb[80].mxu1 }
 0x266   : > { %v1873_v10 = vadd.f32 %v3013_v9, %v3492_v23  ;;  %v1864_v51 = vpop.f32.mrb[81].mxu1 }
 0x267   : > { %v1865_v13 = vadd.f32 %v3492_v23, %v1864_v51  ;;  %v3014_v15 = vpop.f32.mrb[82].mxu1 }
 0x268   : > { %2742 = vmatpush3.bf16.xpose.msra.mxu1 %v3606_v12  ;;  %v1876_v11 = vadd.f32 %v3014_v15, %v3492_v23  ;;  %v1867_v17 = vpop.f32.mrb[83].mxu1  ;;  %v2137_v22 = vmax.f32 %v1873_v10, 0.0  ;;  %v2248_v12 = vld [vmem:[%s3785_s6] sm:$0xff] }
 0x269   : > { %v1868_v21 = vadd.f32 %v3492_v23, %v1867_v17  ;;  %v2135_v50 = vmax.f32 %v1865_v13, 0.0  ;;  %2251 = vperm.xlu0 %3069, %v2248_v12  }
 0x26a   : > { %v2138_v24 = vmax.f32 %v1876_v11, 0.0 }
 0x26b   : > { %v2136_v16 = vmax.f32 %v1868_v21, 0.0 }
 0x26c   : > { %v2224_v25 = vpack.c.bf16 %v2138_v24, %v2137_v22 }
 0x26d   : > { %v2223_v19 = vpack.c.bf16 %v2136_v16, %v2135_v50  ;;  %v3017_v26 = vpop.f32.mrb[84].mxu1 }
 0x26e   : > { %v1889_v27 = vadd.f32 %v3017_v26, %v3492_v23  ;;  %v1880_v28 = vpop.f32.mrb[85].mxu1 }
 0x26f   : > { %2745 = vmatprep.subr.bf16.mxu0 %v2223_v19  ;;  %v1881_v3 = vadd.f32 %v3492_v23, %v1880_v28  ;;  %v3018_v30 = vpop.f32.mrb[86].mxu1  ;;  %2744 = vmatmul.mubr.bf16.vlgmr.msra.gmra.mrb[128].mxu1 %v3555_v37 }
 0x270   : > { %2746 = vmatpush3.bf16.xpose.msra.mxu0 %v3639_v20  ;;  %v1892_v31 = vadd.f32 %v3018_v30, %v3492_v23  ;;  %v1883_v48 = vpop.f32.mrb[87].mxu1  ;;  %2779 = vmatprep.mubr.bf16.mxu1 %v3555_v37  ;;  %v2141_v36 = vmax.f32 %v1889_v27, 0.0 }
 0x271   : > { %2747 = vmatprep.subr.bf16.mxu0 %v2224_v25  ;;  %v1884_v32 = vadd.f32 %v3492_v23, %v1883_v48  ;;  %v2139_v38 = vmax.f32 %v1881_v3, 0.0 }
 0x272   : > { %v2142_v14 = vmax.f32 %v1892_v31, 0.0 }
 0x273   : > { %v2140_v39 = vmax.f32 %v1884_v32, 0.0 }
 0x274   : > { %v2226_v40 = vpack.c.bf16 %v2142_v14, %v2141_v36 }
 0x275   : > { %v2225_v18 = vpack.c.bf16 %v2140_v39, %v2139_v38  ;;  %v3021_v43 = vpop.f32.mrb[88].mxu1 }
 0x276   : > { %v1905_v20 = vadd.f32 %v3021_v43, %v3492_v23  ;;  %v1896_v44 = vpop.f32.mrb[89].mxu1 }
 0x277   : > { %v1897_v45 = vadd.f32 %v3492_v23, %v1896_v44  ;;  %v3022_v1 = vpop.f32.mrb[90].mxu1 }
 0x278   : > { %2748 = vmatpush3.bf16.xpose.msra.mxu0 %v3637_v29  ;;  %v1908_v46 = vadd.f32 %v3022_v1, %v3492_v23  ;;  %v1899_v53 = vpop.f32.mrb[91].mxu1  ;;  %v2145_v54 = vmax.f32 %v1905_v20, 0.0 }
 0x279   : > { %2749 = vmatprep.subr.bf16.mxu0 %v2225_v18  ;;  %v1900_v34 = vadd.f32 %v3492_v23, %v1899_v53  ;;  %v2143_v57 = vmax.f32 %v1897_v45, 0.0 }
 0x27a   : > { %v2146_v56 = vmax.f32 %v1908_v46, 0.0 }
 0x27b   : > { %v2144_v58 = vmax.f32 %v1900_v34, 0.0 }
 0x27c   : > { %v2228_v49 = vpack.c.bf16 %v2146_v56, %v2145_v54 }
 0x27d   : > { %v2227_v61 = vpack.c.bf16 %v2144_v58, %v2143_v57  ;;  %v3025_v62 = vpop.f32.mrb[92].mxu1 }
 0x27e   : > { %v1921_v55 = vadd.f32 %v3025_v62, %v3492_v23  ;;  %v1912_v0 = vpop.f32.mrb[93].mxu1 }
 0x27f   : > { %v1913_v63 = vadd.f32 %v3492_v23, %v1912_v0  ;;  %v3026_v52 = vpop.f32.mrb[94].mxu1 }
 0x280   : > { %2750 = vmatpush3.bf16.xpose.msra.mxu0 %v3648_v42  ;;  %v1924_v29 = vadd.f32 %v3026_v52, %v3492_v23  ;;  %v1915_v2 = vpop.f32.mrb[95].mxu1  ;;  %v2149_v5 = vmax.f32 %v1921_v55, 0.0  ;;  %v3726_v55 = vld [vmem:[%s3783_s4] ss:$0 sm:$0xff] }
 0x281   : > { %2751 = vmatprep.subr.bf16.mxu0 %v2226_v40  ;;  %v1916_v4 = vadd.f32 %v3492_v23, %v1915_v2  ;;  %v2147_v6 = vmax.f32 %v1913_v63, 0.0 }
 0x282   : > { %v2150_v33 = vmax.f32 %v1924_v29, 0.0 }
 0x283   : > { %v2148_v47 = vmax.f32 %v1916_v4, 0.0 }
 0x284   : > { %v2230_v9 = vpack.c.bf16 %v2150_v33, %v2149_v5 }
 0x285   : > { %v2229_v10 = vpack.c.bf16 %v2148_v47, %v2147_v6  ;;  %v3029_v51 = vpop.f32.mrb[96].mxu1 }
 0x286   : > { %v1937_v13 = vadd.f32 %v3029_v51, %v3492_v23  ;;  %v1928_v15 = vpop.f32.mrb[97].mxu1 }
 0x287   : > { %v1929_v11 = vadd.f32 %v3492_v23, %v1928_v15  ;;  %v3030_v17 = vpop.f32.mrb[98].mxu1 }
 0x288   : > { %2752 = vmatpush3.bf16.xpose.msra.mxu0 %v3646_v41  ;;  %v1940_v42 = vadd.f32 %v3030_v17, %v3492_v23  ;;  %v1931_v21 = vpop.f32.mrb[99].mxu1  ;;  %v2153_v24 = vmax.f32 %v1937_v13, 0.0 }
 0x289   : > { %2753 = vmatprep.subr.bf16.mxu0 %v2227_v61  ;;  %v1932_v22 = vadd.f32 %v3492_v23, %v1931_v21  ;;  %v2151_v16 = vmax.f32 %v1929_v11, 0.0 }
 0x28a   : > { %v2154_v50 = vmax.f32 %v1940_v42, 0.0 }
 0x28b   : > { %v2152_v25 = vmax.f32 %v1932_v22, 0.0 }
 0x28c   : > { %v3698_v19 = vpack.c.bf16 %v2154_v50, %v2153_v24 }
 0x28d   : > { %v3700_v26 = vpack.c.bf16 %v2152_v25, %v2151_v16  ;;  %v3033_v27 = vpop.f32.mrb[100].mxu1 }
 0x28e   : > { %v1953_v28 = vadd.f32 %v3033_v27, %v3492_v23  ;;  %v1944_v3 = vpop.f32.mrb[101].mxu1 }
 0x28f   : > { %v1945_v41 = vadd.f32 %v3492_v23, %v1944_v3  ;;  %v3034_v30 = vpop.f32.mrb[102].mxu1 }
 0x290   : > { %2754 = vmatpush3.bf16.xpose.msra.mxu0 %v3657_v60  ;;  %v1956_v12 = vadd.f32 %v3034_v30, %v3492_v23  ;;  %v1947_v31 = vpop.f32.mrb[103].mxu1  ;;  %v2157_v32 = vmax.f32 %v1953_v28, 0.0 }
 0x291   : > { %2755 = vmatprep.subr.bf16.mxu0 %v2228_v49  ;;  %v1948_v48 = vadd.f32 %v3492_v23, %v1947_v31  ;;  %v2155_v36 = vmax.f32 %v1945_v41, 0.0 }
 0x292   : > { %v2158_v35 = vmax.f32 %v1956_v12, 0.0 }
 0x293   : > { %v2156_v14 = vmax.f32 %v1948_v48, 0.0 }
 0x294   : > { %v3707_v38 = vpack.c.bf16 %v2158_v35, %v2157_v32 }
 0x295   : > { %v3709_v39 = vpack.c.bf16 %v2156_v14, %v2155_v36  ;;  %v3037_v40 = vpop.f32.mrb[104].mxu1 }
 0x296   : > { %v1969_v18 = vadd.f32 %v3037_v40, %v3492_v23  ;;  %v1960_v43 = vpop.f32.mrb[105].mxu1 }
 0x297   : > { %v1961_v60 = vadd.f32 %v3492_v23, %v1960_v43  ;;  %v3038_v20 = vpop.f32.mrb[106].mxu1 }
 0x298   : > { %2756 = vmatpush3.bf16.xpose.msra.mxu0 %v3655_v59  ;;  %v1972_v44 = vadd.f32 %v3038_v20, %v3492_v23  ;;  %v1963_v45 = vpop.f32.mrb[107].mxu1  ;;  %v2161_v46 = vmax.f32 %v1969_v18, 0.0 }
 0x299   : > { %2757 = vmatprep.subr.bf16.mxu0 %v2229_v10  ;;  %v1964_v1 = vadd.f32 %v3492_v23, %v1963_v45  ;;  %v2159_v34 = vmax.f32 %v1961_v60, 0.0 }
 0x29a   : > { %v2162_v53 = vmax.f32 %v1972_v44, 0.0 }
 0x29b   : > { %v2160_v54 = vmax.f32 %v1964_v1, 0.0 }
 0x29c   : > { %v3716_v56 = vpack.c.bf16 %v2162_v53, %v2161_v46 }
 0x29d   : > { %v3718_v57 = vpack.c.bf16 %v2160_v54, %v2159_v34  ;;  %v3041_v58 = vpop.f32.mrb[108].mxu1 }
 0x29e   : > { %v1985_v49 = vadd.f32 %v3041_v58, %v3492_v23  ;;  %v1976_v61 = vpop.f32.mrb[109].mxu1 }
 0x29f   : > { %v1977_v59 = vadd.f32 %v3492_v23, %v1976_v61  ;;  %v3042_v62 = vpop.f32.mrb[110].mxu1 }
 0x2a0   : > { %2758 = vmatpush3.bf16.xpose.msra.mxu0 %v3666_v8  ;;  %v1988_v0 = vadd.f32 %v3726_v55, %v3042_v62  ;;  %v1979_v63 = vpop.f32.mrb[111].mxu1  ;;  %v2165_v29 = vmax.f32 %v1985_v49, 0.0 }
 0x2a1   : > { %v1980_v52 = vadd.f32 %v3726_v55, %v1979_v63  ;;  %2759 = vmatprep.subr.bf16.mxu0 %v2230_v9  ;;  %v2163_v4 = vmax.f32 %v1977_v59, 0.0 }
 0x2a2   : > { %v2166_v2 = vmax.f32 %v1988_v0, 0.0 }
 0x2a3   : > { %v2164_v5 = vmax.f32 %v1980_v52, 0.0 }
 0x2a4   : > { %v3730_v33 = vpack.c.bf16 %v2166_v2, %v2165_v29 }
 0x2a5   : > { %v3732_v23 = vpack.c.bf16 %v2164_v5, %v2163_v4  ;;  %v3045_v8 = vpop.f32.mrb[112].mxu1 }
 0x2a6   : > { %v2001_v6 = vadd.f32 %v3726_v55, %v3045_v8  ;;  %v1992_v47 = vpop.f32.mrb[113].mxu1 }
 0x2a7   : > { %v1993_v10 = vadd.f32 %v3726_v55, %v1992_v47  ;;  %v3046_v51 = vpop.f32.mrb[114].mxu1 }
 0x2a8   : > { %v2004_v13 = vadd.f32 %v3726_v55, %v3046_v51  ;;  %v1995_v15 = vpop.f32.mrb[115].mxu1  ;;  %2760 = vmatpush3.bf16.xpose.msra.mxu0 %v3664_v7  ;;  %v2169_v11 = vmax.f32 %v2001_v6, 0.0 }
 0x2a9   : > { %v1996_v9 = vadd.f32 %v3726_v55, %v1995_v15  ;;  %v2167_v42 = vmax.f32 %v1993_v10, 0.0 }
 0x2aa   : > { %v2170_v17 = vmax.f32 %v2004_v13, 0.0 }
 0x2ab   : > { %v2168_v21 = vmax.f32 %v1996_v9, 0.0 }
 0x2ac   : > { %v2240_v22 = vpack.c.bf16 %v2170_v17, %v2169_v11 }
 0x2ad   : > { %v2239_v24 = vpack.c.bf16 %v2168_v21, %v2167_v42  ;;  %v3049_v50 = vpop.f32.mrb[116].mxu1 }
 0x2ae   : > { %v2017_v16 = vadd.f32 %v3726_v55, %v3049_v50  ;;  %v2008_v25 = vpop.f32.mrb[117].mxu1 }
 0x2af   : > { %2763 = vmatprep.subr.bf16.mxu1 %v2239_v24  ;;  %v2009_v27 = vadd.f32 %v3726_v55, %v2008_v25  ;;  %v3050_v28 = vpop.f32.mrb[118].mxu1  ;;  %2762 = vmatmul.mubr.bf16.vlgmr.msra.gmra.mrb[132].mxu0 %v3555_v37 }
 0x2b0   : > { %2764 = vmatpush3.bf16.xpose.msra.mxu1 %v3700_v26  ;;  %v2173_v7 = vmax.f32 %v2017_v16, 0.0  ;;  %v2020_v3 = vadd.f32 %v3726_v55, %v3050_v28  ;;  %v2011_v41 = vpop.f32.mrb[119].mxu1 }
 0x2b1   : > { %v2171_v30 = vmax.f32 %v2009_v27, 0.0  ;;  %2765 = vmatprep.subr.bf16.mxu1 %v2240_v22  ;;  %v2012_v12 = vadd.f32 %v3726_v55, %v2011_v41 }
 0x2b2   : > { %v2174_v31 = vmax.f32 %v2020_v3, 0.0 }
 0x2b3   : > { %v2172_v48 = vmax.f32 %v2012_v12, 0.0 }
 0x2b4   : > { %v2242_v32 = vpack.c.bf16 %v2174_v31, %v2173_v7 }
 0x2b5   : > { %v2241_v35 = vpack.c.bf16 %v2172_v48, %v2171_v30  ;;  %v3053_v36 = vpop.f32.mrb[120].mxu1 }
 0x2b6   : > { %v2033_v14 = vadd.f32 %v3726_v55, %v3053_v36  ;;  %v2024_v40 = vpop.f32.mrb[121].mxu1 }
 0x2b7   : > { %v2025_v18 = vadd.f32 %v3726_v55, %v2024_v40  ;;  %v3054_v43 = vpop.f32.mrb[122].mxu1 }
 0x2b8   : > { %2766 = vmatpush3.bf16.xpose.msra.mxu1 %v3698_v19  ;;  %v2177_v26 = vmax.f32 %v2033_v14, 0.0  ;;  %v2036_v60 = vadd.f32 %v3726_v55, %v3054_v43  ;;  %v2027_v20 = vpop.f32.mrb[123].mxu1 }
 0x2b9   : > { %2767 = vmatprep.subr.bf16.mxu1 %v2241_v35  ;;  %v2175_v44 = vmax.f32 %v2025_v18, 0.0  ;;  %v2028_v45 = vadd.f32 %v3726_v55, %v2027_v20 }
 0x2ba   : > { %v2178_v1 = vmax.f32 %v2036_v60, 0.0 }
 0x2bb   : > { %v2176_v46 = vmax.f32 %v2028_v45, 0.0 }
 0x2bc   : > { %v2244_v53 = vpack.c.bf16 %v2178_v1, %v2177_v26 }
 0x2bd   : > { %v2243_v34 = vpack.c.bf16 %v2176_v46, %v2175_v44  ;;  %v3057_v54 = vpop.f32.mrb[124].mxu1 }
 0x2be   : > { %v2049_v58 = vadd.f32 %v3726_v55, %v3057_v54  ;;  %v2040_v49 = vpop.f32.mrb[125].mxu1 }
 0x2bf   : > { %v2041_v61 = vadd.f32 %v3726_v55, %v2040_v49  ;;  %v3058_v59 = vpop.f32.mrb[126].mxu1 }
 0x2c0   : > { %2768 = vmatpush3.bf16.xpose.msra.mxu1 %v3709_v39  ;;  %v2181_v19 = vmax.f32 %v2049_v58, 0.0  ;;  %v2052_v62 = vadd.f32 %v3726_v55, %v3058_v59  ;;  %v2043_v0 = vpop.f32.mrb[127].mxu1 }
 0x2c1   : > { %2769 = vmatprep.subr.bf16.mxu1 %v2242_v32  ;;  %v2179_v63 = vmax.f32 %v2041_v61, 0.0  ;;  %v2044_v52 = vadd.f32 %v3726_v55, %v2043_v0 }
 0x2c2   : > { %v2182_v29 = vmax.f32 %v2052_v62, 0.0 }
 0x2c3   : > { %v2180_v2 = vmax.f32 %v2044_v52, 0.0 }
 0x2c4   : > { %v2246_v4 = vpack.c.bf16 %v2182_v29, %v2181_v19 }
 0x2c5   : > { %v2245_v5 = vpack.c.bf16 %v2180_v2, %v2179_v63 }
 0x2c8   : > { %2770 = vmatpush3.bf16.xpose.msra.mxu1 %v3707_v38 }
 0x2c9   : > { %2771 = vmatprep.subr.bf16.mxu1 %v2243_v34 }
 0x2d0   : > { %2772 = vmatpush3.bf16.xpose.msra.mxu1 %v3718_v57 }
 0x2d1   : > { %2773 = vmatprep.subr.bf16.mxu1 %v2244_v53 }
 0x2d8   : > { %2774 = vmatpush3.bf16.xpose.msra.mxu1 %v3716_v56 }
 0x2d9   : > { %2775 = vmatprep.subr.bf16.mxu1 %v2245_v5 }
 0x2e0   : > { %2776 = vmatpush3.bf16.xpose.msra.mxu1 %v3732_v23 }
 0x2e1   : > { %2777 = vmatprep.subr.bf16.mxu1 %v2246_v4 }
 0x2e8   : > { %2778 = vmatpush3.bf16.xpose.msra.mxu1 %v3730_v33  ;;  %v2252_v38 = vpop.permute.xlu0 %2251 }
 0x2ef   : > { %2780 = vmatmul.mubr.bf16.vlgmr.msra.gmra.mrb[132].mxu1 %v3555_v37 }
 0x302   : > { %v2288_v39 = vpop.f32.mrb[128].mxu0 }
 0x303   : > { %v2290_v56 = vpop.f32.mrb[129].mxu0  ;;  %v2289_v57 = vadd.f32 %v2288_v39, %v2252_v38 }
 0x304   : > { %v2292_v55 = vpop.f32.mrb[130].mxu0  ;;  %v2291_v37 = vadd.f32 %v2290_v56, %v2252_v38 }
 0x305   : > { %2418 = vst [vmem:[%s3766_s27] sm:$0xff] %v2289_v57  ;;  %v2293_v33 = vpop.f32.mrb[131].mxu0 }
 0x306   : > { %2419 = vst [vmem:[%s3766_s27 + $0x8] sm:$0xff] %v2291_v37 }
 0x342   : > { %v2329_v23 = vpop.f32.mrb[128].mxu1 }
 0x343   : > { %v2331_v8 = vpop.f32.mrb[129].mxu1  ;;  %v2330_v6 = vadd.f32 %v2329_v23, %v2252_v38 }
 0x344   : > { %v2333_v47 = vpop.f32.mrb[130].mxu1  ;;  %v2332_v10 = vadd.f32 %v2331_v8, %v2252_v38 }
 0x345   : > { %2420 = vst [vmem:[%s3766_s27 + $0x10] sm:$0xff] %v2330_v6  ;;  %v2334_v51 = vpop.f32.mrb[131].mxu1 }
 0x346   : > { %2421 = vst [vmem:[%s3766_s27 + $0x18] sm:$0xff] %v2332_v10 }
 0x382   : > { %v2370_v13 = vpop.f32.mrb[132].mxu0 }
 0x383   : > { %v2371_v15 = vadd.f32 %v2370_v13, %v2252_v38  ;;  %v2372_v9 = vpop.f32.mrb[133].mxu0 }
 0x384   : > { %v2373_v11 = vadd.f32 %v2372_v9, %v2252_v38  ;;  %v2374_v17 = vpop.f32.mrb[134].mxu0 }
 0x385   : > { %2422 = vst [vmem:[%s3766_s27 + $0x20] sm:$0xff] %v2371_v15  ;;  %v2375_v42 = vpop.f32.mrb[135].mxu0 }
 0x386   : > { %2423 = vst [vmem:[%s3766_s27 + $0x28] sm:$0xff] %v2373_v11 }
 0x3c2   : > { %v2411_v21 = vpop.f32.mrb[132].mxu1 }
 0x3c3   : > { %v2412_v22 = vadd.f32 %v2411_v21, %v2252_v38  ;;  %v2413_v24 = vpop.f32.mrb[133].mxu1 }
 0x3c4   : > { %v2414_v50 = vadd.f32 %v2413_v24, %v2252_v38  ;;  %v2415_v16 = vpop.f32.mrb[134].mxu1 }
 0x3c5   : > { %2424 = vst [vmem:[%s3766_s27 + $0x30] sm:$0xff] %v2412_v22  ;;  %v2416_v25 = vpop.f32.mrb[135].mxu1 }
 0x3c6   : > { %2425 = vst [vmem:[%s3766_s27 + $0x38] sm:$0xff] %v2414_v50 }
 0x3c7 PF: > { %s17_s24 = sadd.s32 1, %s3089_s24  }
 0x3c8   : > { %p14_p5 = scmp.ge.s32.totalorder %s17_s24, 4  }
 0x3ca   :  { %16 = sbr.rel (!%p14_p5) target bundleno = 1 (0x1), region = 78 }

</bundles_post_ra>
